<compile_context>
chip_gen: v6e
topology: v6e:2x2x1
jax: 0.10.0
libtpu: 0.0.40
codegen_flags: <defaults>
</compile_context>

<pallas_src>
import math

import jax
import jax.numpy as jnp
from jax.experimental import pallas as pl
from jax.experimental.pallas import tpu as pltpu


def _make_rff_kernel(scale: float):
    # `scale` stays a plain Python float so it folds into the kernel as a
    # compile-time constant (capturing a jnp array here is what broke tracing).
    def kernel(x_ref, w_ref, real_ref, imag_ref):
        # MXU matmul: vals = x_tile @ W_tile, f32 accumulate.  (tb, td)
        vals = jnp.dot(x_ref[...], w_ref[...], preferred_element_type=jnp.float32)
        # Complex RFF: (cos + i*sin) * sqrt(1/D).  EUP transcendentals dominate.
        real_ref[...] = jnp.cos(vals) * scale
        imag_ref[...] = jnp.sin(vals) * scale
        # Row-norm division of the PyTorch forward is analytically 1.0 and is
        # intentionally omitted (see module docstring at the top of the file).

    return kernel


def _pick_tile(n: int, preferred: int, granule: int) -> int:
    """Largest multiple of `granule` that divides n and is <= preferred.

    Falls back to the full extent n (always a legal BlockSpec block dim)."""
    t = min(preferred, n)
    t -= t % granule
    while t >= granule:
        if n % t == 0:
            return t
        t -= granule
    return n


def qfeature_map_complex_rff(x, rff_weights, *, tb_pref: int = 256, td_pref: int = 512):
    """Pallas implementation of QFeatureMapComplexRFF.forward (fixed sampled weights).

    Returns (real, imag), each (batch, dim) float32.  The complex64 output of
    the PyTorch module is simply real + i*imag.
    """
    x = x.astype(jnp.float32)
    rff_weights = rff_weights.astype(jnp.float32)

    B, din = x.shape
    din2, D = rff_weights.shape
    assert din == din2, "weight/input dim mismatch"

    scale = math.sqrt(1.0 / D)
    kernel = _make_rff_kernel(scale)

    # Tile sizes: lane-dense outputs (td multiple of 128 or == D), sublane-clean
    # batch tiles (tb multiple of 8 or == B).  tb_pref/td_pref are conservative
    # enough to fit v7x's 64 MiB VMEM with double-buffered outputs.
    tb = _pick_tile(B, tb_pref, 8)
    td = _pick_tile(D, td_pref, 128)
    grid = (B // tb, D // td)

    cost = pl.CostEstimate(
        flops=2 * B * din * D,
        transcendentals=2 * B * D,                      # one sin + one cos per output
        bytes_accessed=4 * (B * din + din * D + 2 * B * D),
    )

    real, imag = pl.pallas_call(
        kernel,
        out_shape=(
            jax.ShapeDtypeStruct((B, D), jnp.float32),
            jax.ShapeDtypeStruct((B, D), jnp.float32),
        ),
        grid=grid,
        in_specs=[
            pl.BlockSpec((tb, din), lambda i, j: (i, 0)),   # x rows for this batch tile
            pl.BlockSpec((din, td), lambda i, j: (0, j)),   # W columns for this dim tile
        ],
        out_specs=(
            pl.BlockSpec((tb, td), lambda i, j: (i, j)),
            pl.BlockSpec((tb, td), lambda i, j: (i, j)),
        ),
        compiler_params=pltpu.CompilerParams(
            dimension_semantics=("parallel", "parallel"),   # megacore split on v7x
        ),
        cost_estimate=cost,
    )(x, rff_weights)

    return real, imag


def _reference(x, rff_weights):
    """Pure-JAX reference mirroring the PyTorch forward exactly (incl. the quirky
    unsqueeze(0) broadcast, which requires batch == dim)."""
    D = rff_weights.shape[1]
    vals = x.astype(jnp.float32) @ rff_weights.astype(jnp.float32)
    vals = jax.lax.complex(jnp.cos(vals), jnp.sin(vals))
    vals = vals * jnp.complex64(math.sqrt(1.0 / D))
    norms = jnp.sqrt(jnp.sum(jnp.abs(vals) ** 2, axis=1))   # torch.norm(vals, dim=1)
    return vals / norms[None, :]                            # torch.unsqueeze(norms, 0)


if __name__ == "__main__":
    # Module hyper-params (deterministic synthetic init — no sklearn / checkpoint).
    input_dim = 16
    dim = 128
    batch = 128        # the module's unsqueeze(0) broadcast only works when batch == dim
    gamma = 1.0

    key = jax.random.PRNGKey(0)
    kw, ko, kx = jax.random.split(key, 3)

    # RBFSampler.fit equivalent: random_weights_ = sqrt(2*gamma) * N(0,1), shape (input_dim, dim);
    # random_offset_ = U(0, 2*pi), shape (dim,) — stored by the module but unused in forward.
    rff_weights = jnp.sqrt(2.0 * gamma) * jax.random.normal(kw, (input_dim, dim), jnp.float32)
    random_offset = jax.random.uniform(ko, (dim,), jnp.float32, 0.0, 2.0 * math.pi)  # unused

    x = jax.random.normal(kx, (batch, input_dim), jnp.float32)

    real, imag = qfeature_map_complex_rff(x, rff_weights)
    real, imag = jax.block_until_ready((real, imag))

    # Demo-only: assemble complex64 (the module's output dtype) for the check.
    psi = jax.lax.complex(real, imag)
    ref = _reference(x, rff_weights)

    assert psi.shape == (batch, dim) and psi.dtype == jnp.complex64
    assert jnp.allclose(psi, ref, rtol=1e-4, atol=1e-4)

    print("KERNEL_OK")
</pallas_src>

<mosaic_0001>
module attributes {stable_mosaic.version = 11 : i64} {
  func.func @kernel(%arg0: i32, %arg1: i32, %arg2: memref<128x16xf32, #tpu.memory_space<vmem>>, %arg3: memref<16x128xf32, #tpu.memory_space<vmem>>, %arg4: memref<128x128xf32, #tpu.memory_space<vmem>>, %arg5: memref<128x128xf32, #tpu.memory_space<vmem>>) attributes {dimension_semantics = [#tpu.dimension_semantics<parallel>, #tpu.dimension_semantics<parallel>], iteration_bounds = array<i64: 1, 1>, scalar_prefetch = 0 : i64, scratch_operands = 0 : i64, tpu.core_type = #tpu.core_type<tc>, window_params = [{transform_indices = @transform_0, window_bounds = array<i64: 128, 16>}, {transform_indices = @transform_1, window_bounds = array<i64: 16, 128>}, {transform_indices = @transform_2, window_bounds = array<i64: 128, 128>}, {transform_indices = @transform_3, window_bounds = array<i64: 128, 128>}]} {
    %c0 = arith.constant 0 : index
    %c0_0 = arith.constant 0 : index
    %0 = vector.load %arg2[%c0, %c0_0] : memref<128x16xf32, #tpu.memory_space<vmem>>, vector<128x16xf32>
    %c0_1 = arith.constant 0 : index
    %c0_2 = arith.constant 0 : index
    %1 = vector.load %arg3[%c0_1, %c0_2] : memref<16x128xf32, #tpu.memory_space<vmem>>, vector<16x128xf32>
    %cst = arith.constant dense<0.000000e+00> : vector<128x128xf32>
    %2 = tpu.matmul %0, %1, %cst {dimension_numbers = #tpu.dot_dimension_numbers<[1], [0], [0], [1], [0, 0, 1, 1], [], []>} : vector<128x16xf32>, vector<16x128xf32>, vector<128x128xf32> -> vector<128x128xf32>
    %3 = math.cos %2 : vector<128x128xf32>
    %cst_3 = arith.constant 0.0883883461 : f32
    %4 = vector.broadcast %cst_3 : f32 to vector<128x128xf32>
    %5 = arith.mulf %3, %4 : vector<128x128xf32>
    %c0_4 = arith.constant 0 : index
    %c0_5 = arith.constant 0 : index
    %6 = vector.load %arg4[%c0_4, %c0_5] : memref<128x128xf32, #tpu.memory_space<vmem>>, vector<128x128xf32>
    tpu.vector_store %arg4[%c0_4, %c0_5], %5 {strides = array<i32>} : memref<128x128xf32, #tpu.memory_space<vmem>>, vector<128x128xf32>,
    %7 = math.sin %2 : vector<128x128xf32>
    %cst_6 = arith.constant 0.0883883461 : f32
    %8 = vector.broadcast %cst_6 : f32 to vector<128x128xf32>
    %9 = arith.mulf %7, %8 : vector<128x128xf32>
    %c0_7 = arith.constant 0 : index
    %c0_8 = arith.constant 0 : index
    %10 = vector.load %arg5[%c0_7, %c0_8] : memref<128x128xf32, #tpu.memory_space<vmem>>, vector<128x128xf32>
    tpu.vector_store %arg5[%c0_7, %c0_8], %9 {strides = array<i32>} : memref<128x128xf32, #tpu.memory_space<vmem>>, vector<128x128xf32>,
    return
  }
  func.func @transform_0(%arg0: i32, %arg1: i32) -> (i32, i32) {
    %c0_i32 = arith.constant 0 : i32
    %c0_i32_0 = arith.constant 0 : i32
    return %arg0, %c0_i32 : i32, i32
  }
  func.func @transform_1(%arg0: i32, %arg1: i32) -> (i32, i32) {
    %c0_i32 = arith.constant 0 : i32
    %c0_i32_0 = arith.constant 0 : i32
    return %c0_i32, %arg1 : i32, i32
  }
  func.func @transform_2(%arg0: i32, %arg1: i32) -> (i32, i32) {
    %c0_i32 = arith.constant 0 : i32
    return %arg0, %arg1 : i32, i32
  }
  func.func @transform_3(%arg0: i32, %arg1: i32) -> (i32, i32) {
    %c0_i32 = arith.constant 0 : i32
    return %arg0, %arg1 : i32, i32
  }
}

</mosaic_0001>

<bundles_post_ra>
// kernel: tpu_custom_call.1
= control target key start
LH: loop header
LB: loop body
LE: loop exit
PB: predicated region body
PF: predicated region fallthrough
CT: control target
= control target key end

     0   :  { %9 = vsyncpa [#allocation3], 0  ;;  %vm33_vm0 = vcmask 130048   ;;  %s5566_s0 = inlined_call_operand.vmem [shape: f32[128,16], index: 0, kind: input, shape index: {}]   ;;  %s5567_s1 = inlined_call_operand.vmem [shape: f32[16,128], index: 1, kind: input, shape index: {}]   ;;  %s5568_s2 = inlined_call_operand.hbm [shape: f32[128,128], index: 2, kind: output, shape index: {0}]   ;;  %s5569_s3 = inlined_call_operand.hbm [shape: f32[128,128], index: 3, kind: output, shape index: {1}]  }
   0x1   :  { %v32_v0 = vld [vmem:[%s5567_s1 + $0x8] sm:$0xff]  ;;  %v31_v1 = vld [vmem:[%s5567_s1] sm:$0xff]  ;;  %v17_v6 = vld [vmem:[%s5566_s0 + $0x10] sm:$0xff] }
   0x2   :  { %3797 = vmatprep.subr.mxu0 %v32_v0  ;;  %3825 = vmatprep.subr.mxu1 %v32_v0  ;;  %v15_v2 = vld [vmem:[%s5566_s0] sm:$0xff]  ;;  %v16_v4 = vld [vmem:[%s5566_s0 + $0x8] sm:$0xff]  ;;  %v25_v7 = vld [vmem:[%s5566_s0 + $0x50] sm:$0xff] }
   0x3   :  { %3798 = vmatpush3.msra.mxu0 %v32_v0  ;;  %3827 = vmatpush3.msra.mxu1 %v32_v0  ;;  %v23_v3 = vld [vmem:[%s5566_s0 + $0x40] sm:$0xff]  ;;  %v24_v5 = vld [vmem:[%s5566_s0 + $0x48] sm:$0xff] }
   0x4   :  { %3799 = vmatprep.subr.mxu0 %v31_v1  ;;  %3826 = vmatprep.subr.mxu1 %v31_v1 }
   0x5   :  { %3800 = vmatpush3.msra.mxu0 %v31_v1  ;;  %3828 = vmatpush3.msra.mxu1 %v31_v1 }
   0x6   :  { %3801 = vmatprep.mubr.msk.f32.mxu0 %vm33_vm0, %v15_v2  ;;  %3813 = vmatprep.mubr.msk.f32.mxu1 %vm33_vm0, %v23_v3 }
   0x7   :  { %3802 = vmatmul.mubr.msk.f32.vlgmr.msra.gmra.mxu0 %vm33_vm0, %v16_v4  ;;  %3814 = vmatmul.mubr.msk.f32.vlgmr.msra.gmra.mxu1 %vm33_vm0, %v24_v5 }
   0x8   :  { %10 = vsyncpa [#allocation5], 0  ;;  %3804 = vmatprep.mubr.msk.f32.mxu0 %vm33_vm0, %v17_v6  ;;  %3816 = vmatprep.mubr.msk.f32.mxu1 %vm33_vm0, %v25_v7  ;;  %v18_v8 = vld [vmem:[%s5566_s0 + $0x18] sm:$0xff]  ;;  %v19_v10 = vld [vmem:[%s5566_s0 + $0x20] sm:$0xff]  ;;  %v4011_v47 = vmov 683565275  }
   0x9   :  { %v26_v9 = vld [vmem:[%s5566_s0 + $0x58] sm:$0xff]  ;;  %v27_v11 = vld [vmem:[%s5566_s0 + $0x60] sm:$0xff]  ;;  %v20_v12 = vld [vmem:[%s5566_s0 + $0x28] sm:$0xff]  ;;  %v4012_v51 = vmov 2475754826   ;;  %s4018_s21 = smov [#allocation4]  }
   0xa   :  { %v28_v13 = vld [vmem:[%s5566_s0 + $0x68] sm:$0xff]  ;;  %v21_v14 = vld [vmem:[%s5566_s0 + $0x30] sm:$0xff]  ;;  %v22_v16 = vld [vmem:[%s5566_s0 + $0x38] sm:$0xff]  ;;  %v4013_v53 = vmov 2131351028   ;;  %s3620_s1 = sshll.u32 %s4018_s21, 4  ;;  %s3621_s1 = int_to_ptr.vmem [resolvable:$true] %s3620_s1 }
   0xb   :  { %3805 = vmatmul.mubr.msk.f32.gmra.mxu0 %vm33_vm0, %v18_v8  ;;  %3817 = vmatmul.mubr.msk.f32.gmra.mxu1 %vm33_vm0, %v26_v9  ;;  %v29_v15 = vld [vmem:[%s5566_s0 + $0x70] sm:$0xff]  ;;  %v30_v17 = vld [vmem:[%s5566_s0 + $0x78] sm:$0xff]  ;;  %v4014_v55 = vmov 2102212464   ;;  %v4015_v57 = vmov 920167782  }
   0xc   :  { %3807 = vmatprep.mubr.msk.f32.mxu0 %vm33_vm0, %v19_v10  ;;  %3819 = vmatprep.mubr.msk.f32.mxu1 %vm33_vm0, %v27_v11  ;;  %v4016_v0 = vmov 1326507024   ;;  %s4017_s0 = smov [#allocation2]  }
   0xd   :  { %s3608_s20 = sshll.u32 %s4017_s0, 4  ;;  %s3609_s20 = int_to_ptr.vmem [resolvable:$true] %s3608_s20 }
   0xe   :  { %s3967_s22 = scalar_lea.vmem %s3609_s20, 2048  ;;  %p3972_p1 = scmp.lt.s32.totalorder %s3609_s20, %s3609_s20 }
   0xf   :  { %3808 = vmatmul.mubr.msk.f32.gmra.mxu0 %vm33_vm0, %v20_v12  ;;  %3820 = vmatmul.mubr.msk.f32.gmra.mxu1 %vm33_vm0, %v28_v13  ;;  %p3968_p0 = scmp.ne.s32.totalorder %s3609_s20, %s3967_s22  ;;  %p3973_p2 = scmp.lt.s32.totalorder %s3967_s22, %s3967_s22 }
  0x10   :  { %3810 = vmatprep.mubr.msk.f32.mxu0 %vm33_vm0, %v21_v14  ;;  %3822 = vmatprep.mubr.msk.f32.mxu1 %vm33_vm0, %v29_v15 }
  0x11   :  { %p3974_p3 = por %p3973_p2, %p3972_p1 }
  0x13   :  { %3811 = vmatmul.mubr.msk.f32.gmra.mxu0 %vm33_vm0, %v22_v16  ;;  %3823 = vmatmul.mubr.msk.f32.gmra.mxu1 %vm33_vm0, %v30_v17  ;;  %p3975_p4 = pnand %p3974_p3, %p3968_p0 }
  0xc7   :  { %v4111_v18 = vpop.f32.mrf.mxu0  ;;  %v4113_v19 = vpop.f32.mrf.mxu1 }
  0xc8   :  { %v330_v20 = vand.u32 2147483647, %v4111_v18  ;;  %v333_v21 = vand.u32 2139095040, %v4111_v18  ;;  %v1154_v22 = vand.u32 2147483647, %v4113_v19  ;;  %v1157_v23 = vand.u32 2139095040, %v4113_v19 }
  0xc9   :  { %v4119_v24 = vpop.f32.mrf.mxu0  ;;  %vm332_vm14 = vcmp.lt.s32.totalorder %v4111_v18, 0 }
  0xca   :  { %v334_v25 = vshrl.u32 %v333_v21, 23  ;;  %v337_v26 = vand.u32 8388607, %v330_v20  ;;  %v1158_v27 = vshrl.u32 %v1157_v23, 23  ;;  %v1161_v28 = vand.u32 8388607, %v1154_v22 }
  0xcb   :  { %v230_v29 = vand.u32 2139095040, %v4119_v24  ;;  %v227_v44 = vand.u32 2147483647, %v4119_v24 }
  0xcc   :  { %v3655_v30 = vadd.s32 4294967169, %v334_v25  ;;  %v3687_v31 = vadd.s32 4294967169, %v1158_v27  ;;  %v338_v34 = vor.u32 8388608, %v337_v26  ;;  %v1162_v35 = vor.u32 8388608, %v1161_v28 }
  0xcd   :  { %v231_v32 = vshrl.u32 %v230_v29, 23 }
  0xce   :  { %v340_v33 = vadd.s32 1, %v3655_v30  ;;  %v1164_v36 = vadd.s32 1, %v3687_v31  ;;  %v4126_v42 = vshll.u32 %v338_v34, 8  ;;  %v4128_v43 = vshll.u32 %v1162_v35, 8 }
  0xcf   :  { %v3651_v37 = vadd.s32 4294967169, %v231_v32 }
  0xd0   :  { %vm341_vm1 = vcmp.gt.s32.totalorder %v340_v33, 0  ;;  %vm1165_vm2 = vcmp.gt.s32.totalorder %v1164_v36, 0 }
  0xd1   :  { %v342_v38 = vsel %vm341_vm1, %v340_v33, 0  ;;  %v1166_v41 = vsel %vm1165_vm2, %v1164_v36, 0  ;;  %v4131_v45 = vadd.s32 1, %v3651_v37 }
  0xd2   :  { %v343_v39 = vshrl.u32 %v342_v38, 5  ;;  %v344_v40 = vand.u32 31, %v342_v38  ;;  %v4134_v49 = vshrl.u32 %v1166_v41, 5  ;;  %v1168_v50 = vand.u32 31, %v1166_v41 }
  0xd3   :  { %vm238_vm7 = vcmp.gt.s32.totalorder %v4131_v45, 0 }
  0xd4   :  { %v345_v46 = vsub.s32 32, %v344_v40  ;;  %v347_v48 = vshll.u32 %v4011_v47, %v344_v40  ;;  %v350_v52 = vshll.u32 %v4012_v51, %v344_v40  ;;  %v353_v54 = vshll.u32 %v4013_v53, %v344_v40 }
  0xd5   :  { %v356_v56 = vshll.u32 %v4014_v55, %v344_v40  ;;  %v359_v58 = vshll.u32 %v4015_v57, %v344_v40  ;;  %vm362_vm3 = vcmp.lt.s32.totalorder %v343_v39, 1  ;;  %vm363_vm4 = vcmp.lt.s32.totalorder %v343_v39, 2 }
  0xd6   :  { %v348_v59 = vshrl.u32 %v4012_v51, %v345_v46  ;;  %v351_v60 = vshrl.u32 %v4013_v53, %v345_v46  ;;  %v354_v61 = vshrl.u32 %v4014_v55, %v345_v46  ;;  %v346_v62 = vshrl.u32 %v4011_v47, %v345_v46 }
  0xd7   :  { %v357_v63 = vshrl.u32 %v4015_v57, %v345_v46  ;;  %v360_v1 = vshrl.u32 %v4016_v0, %v345_v46  ;;  %v1169_v5 = vsub.s32 32, %v1168_v50  ;;  %vm364_vm5 = vcmp.lt.s32.totalorder %v343_v39, 3 }
  0xd8   :  { %v349_v2 = vor.u32 %v348_v59, %v347_v48  ;;  %v352_v3 = vor.u32 %v351_v60, %v350_v52  ;;  %v355_v4 = vor.u32 %v354_v61, %v353_v54  ;;  %vm365_vm6 = vcmp.lt.s32.totalorder %v343_v39, 4 }
  0xd9   :  { %v358_v6 = vor.u32 %v357_v63, %v356_v56  ;;  %v361_v7 = vor.u32 %v360_v1, %v359_v58  ;;  %v1171_v15 = vshll.u32 %v4011_v47, %v1168_v50  ;;  %v1172_v21 = vshrl.u32 %v4012_v51, %v1169_v5 }
  0xda   :  { %v366_v8 = vsel %vm362_vm3, %v346_v62, %v349_v2  ;;  %v367_v9 = vsel %vm365_vm6, %v355_v4, 2102212464  ;;  %v370_v10 = vsel %vm362_vm3, %v349_v2, %v352_v3  ;;  %v374_v11 = vsel %vm362_vm3, %v352_v3, %v355_v4 }
  0xdb   :  { %v368_v12 = vsel %vm364_vm5, %v352_v3, %v367_v9  ;;  %v371_v13 = vsel %vm365_vm6, %v358_v6, 920167782  ;;  %v375_v14 = vsel %vm365_vm6, %v361_v7, 1326507024  ;;  %v1174_v23 = vshll.u32 %v4012_v51, %v1168_v50 }
  0xdc   :  { %v372_v16 = vsel %vm364_vm5, %v355_v4, %v371_v13  ;;  %v376_v17 = vsel %vm364_vm5, %v358_v6, %v375_v14  ;;  %v369_v25 = vsel %vm363_vm4, %v366_v8, %v368_v12  ;;  %v1175_v28 = vshrl.u32 %v4013_v53, %v1169_v5  ;;  %v4195_v12 = vpop.f32.mrf.mxu1 }
  0xdd   :  { %v373_v26 = vsel %vm363_vm4, %v370_v10, %v372_v16  ;;  %v377_v27 = vsel %vm363_vm4, %v374_v11, %v376_v17  ;;  %v1173_v33 = vor.u32 %v1172_v21, %v1171_v15  ;;  %v1177_v35 = vshll.u32 %v4013_v53, %v1168_v50 }
  0xde   :  { %v4158_v29 = vmul.u32.u64.low %v4126_v42, %v377_v27  ;;  %v4159_v30 = vmul.u32.u64.high %v4126_v42, %v377_v27, %v4158_v29  ;;  %v4162_v31 = vmul.u32.u64.low %v4126_v42, %v373_v26  ;;  %v4163_v32 = vmul.u32.u64.high %v4126_v42, %v373_v26, %v4162_v31 }
  0xdf   :  { %v1176_v34 = vor.u32 %v1175_v28, %v1174_v23  ;;  %v1178_v36 = vshrl.u32 %v4014_v55, %v1169_v5  ;;  %v1170_v37 = vshrl.u32 %v4011_v47, %v1169_v5  ;;  %v1180_v38 = vshll.u32 %v4014_v55, %v1168_v50 }
  0xe0   :  { %v1181_v39 = vshrl.u32 %v4015_v57, %v1169_v5  ;;  %v1184_v40 = vshrl.u32 %v4016_v0, %v1169_v5  ;;  %v385_v41 = vmul.u32 %v4126_v42, %v369_v25  ;;  %v1183_v48 = vshll.u32 %v4015_v57, %v1168_v50 }
  0xe1   :  { %v1179_v46 = vor.u32 %v1178_v36, %v1177_v35  ;;  %vm1186_vm8 = vcmp.lt.s32.totalorder %v4134_v49, 1  ;;  %vm387_vm9 = vc.u32 %v4159_v30, %v4162_v31  ;;  %v388_v52 = vadd.s32 1, %v4163_v32 }
  0xe2   :  { %v1182_v54 = vor.u32 %v1181_v39, %v1180_v38  ;;  %vm1187_vm10 = vcmp.lt.s32.totalorder %v4134_v49, 2  ;;  %v1185_v56 = vor.u32 %v1184_v40, %v1183_v48  ;;  %vm1188_vm11 = vcmp.lt.s32.totalorder %v4134_v49, 3 }
  0xe3   :  { %vm1189_vm12 = vcmp.lt.s32.totalorder %v4134_v49, 4  ;;  %v1194_v58 = vsel %vm1186_vm8, %v1173_v33, %v1176_v34  ;;  %v389_v42 = vsel %vm387_vm9, %v388_v52, %v4163_v32  ;;  %v1198_v50 = vsel %vm1186_vm8, %v1176_v34, %v1179_v46 }
  0xe4   :  { %v1191_v59 = vsel %vm1189_vm12, %v1179_v46, 2102212464  ;;  %v1195_v60 = vsel %vm1189_vm12, %v1182_v54, 920167782  ;;  %v390_v61 = vadd.s32 %v389_v42, %v385_v41  ;;  %v1190_v62 = vsel %vm1186_vm8, %v1170_v37, %v1173_v33 }
  0xe5   :  { %v1196_v63 = vsel %vm1188_vm11, %v1179_v46, %v1195_v60  ;;  %v1199_v1 = vsel %vm1189_vm12, %v1185_v56, 1326507024  ;;  %v1192_v2 = vsel %vm1188_vm11, %v1176_v34, %v1191_v59  ;;  %v239_v5 = vsel %vm238_vm7, %v4131_v45, 0 }
  0xe6   :  { %v1197_v3 = vsel %vm1187_vm10, %v1194_v58, %v1196_v63  ;;  %v1200_v4 = vsel %vm1188_vm11, %v1182_v54, %v1199_v1  ;;  %v391_v6 = vadd.s32 536870912, %v390_v61  ;;  %v1193_v14 = vsel %vm1187_vm10, %v1190_v62, %v1192_v2 }
  0xe7   :  { %v1201_v7 = vsel %vm1187_vm10, %v1198_v50, %v1200_v4  ;;  %v4188_v8 = vmul.u32.u64.low %v4128_v43, %v1197_v3  ;;  %v4189_v9 = vmul.u32.u64.high %v4128_v43, %v1197_v3, %v4188_v8  ;;  %v234_v45 = vand.u32 8388607, %v227_v44 }
  0xe8   :  { %v4192_v10 = vmul.u32.u64.low %v4128_v43, %v1201_v7  ;;  %v4193_v11 = vmul.u32.u64.high %v4128_v43, %v1201_v7, %v4192_v10  ;;  %v4197_v13 = vshrl.u32 %v391_v6, 30  ;;  %v241_v15 = vand.u32 31, %v239_v5 }
  0xe9   :  { %v1212_v17 = vadd.s32 1, %v4189_v9  ;;  %v1054_v21 = vand.u32 2139095040, %v4195_v12  ;;  %v1209_v23 = vmul.u32 %v4128_v43, %v1193_v14  ;;  %v235_v27 = vor.u32 8388608, %v234_v45 }
  0xea   :  { %v393_v16 = vshll.u32 %v4197_v13, 30  ;;  %vm1211_vm13 = vc.u32 %v4193_v11, %v4188_v8  ;;  %v242_v28 = vsub.s32 32, %v241_v15  ;;  %v386_v34 = vadd.s32 %v4162_v31, %v4159_v30 }
  0xeb   :  { %v1213_v26 = vsel %vm1211_vm13, %v1212_v17, %v4189_v9  ;;  %v1055_v32 = vshrl.u32 %v1054_v21, 23  ;;  %v4210_v36 = vshrl.u32 %v239_v5, 5  ;;  %v4212_v37 = vshll.u32 %v235_v27, 8 }
  0xec   :  { %v394_v25 = vsub.s32 %v390_v61, %v393_v16  ;;  %v1214_v49 = vadd.s32 %v1213_v26, %v1209_v23  ;;  %v245_v43 = vshrl.u32 %v4012_v51, %v242_v28  ;;  %v248_v39 = vshrl.u32 %v4013_v53, %v242_v28 }
  0xed   :  { %v251_v40 = vshrl.u32 %v4014_v55, %v242_v28  ;;  %v253_v46 = vshll.u32 %v4014_v55, %v241_v15  ;;  %v254_v30 = vshrl.u32 %v4015_v57, %v242_v28  ;;  %v3683_v31 = vadd.s32 4294967169, %v1055_v32 }
  0xee   :  { %v396_v29 = vsub.s32 0, %v394_v25  ;;  %v1215_v33 = vadd.s32 536870912, %v1214_v49  ;;  %v244_v52 = vshll.u32 %v4011_v47, %v241_v15  ;;  %v247_v54 = vshll.u32 %v4012_v51, %v241_v15 }
  0xef   :  { %v250_v56 = vshll.u32 %v4013_v53, %v241_v15  ;;  %v255_v42 = vor.u32 %v254_v30, %v253_v46  ;;  %v257_v59 = vshrl.u32 %v4016_v0, %v242_v28  ;;  %vm262_vm15 = vcmp.lt.s32.totalorder %v4210_v36, 4 }
  0xf0   :  { %v3656_v35 = vmin.u32 %v396_v29, %v394_v25  ;;  %v4214_v38 = vshrl.u32 %v1215_v33, 30  ;;  %v246_v50 = vor.u32 %v245_v43, %v244_v52  ;;  %v249_v61 = vor.u32 %v248_v39, %v247_v54 }
  0xf1   :  { %v252_v62 = vor.u32 %v251_v40, %v250_v56  ;;  %v256_v63 = vshll.u32 %v4015_v57, %v241_v15  ;;  %vm259_vm1 = vcmp.lt.s32.totalorder %v4210_v36, 1  ;;  %v268_v1 = vsel %vm262_vm15, %v255_v42, 920167782 }
  0xf2   :  { %v398_v41 = vclz %v3656_v35  ;;  %v1217_v48 = vshll.u32 %v4214_v38, 30  ;;  %v416_v3 = vsub.s32 4, %v4197_v13  ;;  %vm260_vm2 = vcmp.lt.s32.totalorder %v4210_v36, 2 }
  0xf3   :  { %v258_v7 = vor.u32 %v257_v59, %v256_v63  ;;  %vm261_vm3 = vcmp.lt.s32.totalorder %v4210_v36, 3  ;;  %vm4240_vm4 = vcmp.le.f32.partialorder %v330_v20, 0.7853982  ;;  %v1210_v10 = vadd.s32 %v4188_v8, %v4193_v11 }
  0xf4   :  { %v3657_v58 = vadd.s32 4294967294, %v398_v41  ;;  %v4228_v60 = vsub.s32 %v1214_v49, %v1217_v48  ;;  %v267_v45 = vsel %vm259_vm1, %v246_v50, %v249_v61  ;;  %v269_v15 = vsel %vm261_vm3, %v252_v62, %v268_v1 }
  0xf5   :  { %v264_v23 = vsel %vm262_vm15, %v252_v62, 2102212464  ;;  %v417_v20 = vsel %vm332_vm14, %v416_v3, %v4197_v13  ;;  %v243_v8 = vshrl.u32 %v4011_v47, %v242_v28  ;;  %v271_v11 = vsel %vm259_vm1, %v249_v61, %v252_v62 }
  0xf6   :  { %vm3658_vm0 = vcmp.lt.s32.totalorder %v3657_v58, 0  ;;  %v1220_v4 = vsub.s32 0, %v4228_v60  ;;  %vm1156_vm5 = vcmp.lt.s32.totalorder %v4113_v19, 0  ;;  %v272_v29 = vsel %vm262_vm15, %v258_v7, 1326507024 }
  0xf7   :  { %v401_v2 = vsel %vm3658_vm0, 0, %v3657_v58  ;;  %v1240_v33 = vsub.s32 4, %v4214_v38  ;;  %v263_v13 = vsel %vm259_vm1, %v243_v8, %v246_v50  ;;  %v265_v28 = vsel %vm261_vm3, %v249_v61, %v264_v23 }
  0xf8   :  { %v402_v5 = vsub.s32 32, %v401_v2  ;;  %v406_v6 = vsub.s32 4294967266, %v401_v2  ;;  %v3688_v14 = vmin.u32 %v1220_v4, %v4228_v60  ;;  %v403_v16 = vshll.u32 %v394_v25, %v401_v2 }
  0xf9   :  { %v270_v25 = vsel %vm260_vm2, %v267_v45, %v269_v15  ;;  %v273_v43 = vsel %vm261_vm3, %v255_v42, %v272_v29  ;;  %v1061_v39 = vadd.s32 1, %v3683_v31  ;;  %v266_v31 = vsel %vm260_vm2, %v263_v13, %v265_v28 }
  0xfa   :  { %v404_v17 = vshrl.u32 %v386_v34, %v402_v5  ;;  %v407_v21 = vadd.s32 127, %v406_v6  ;;  %v1222_v26 = vclz %v3688_v14  ;;  %v274_v40 = vsel %vm260_vm2, %v271_v11, %v273_v43 }
  0xfb   :  { %v4273_v41 = vmul.u32.u64.low %v4212_v37, %v270_v25  ;;  %v4274_v46 = vmul.u32.u64.high %v4212_v37, %v270_v25, %v4273_v41  ;;  %v4278_v52 = vmul.u32.u64.low %v4212_v37, %v274_v40  ;;  %v4279_v54 = vmul.u32.u64.high %v4212_v37, %v274_v40, %v4278_v52 }
  0xfc   :  { %v405_v27 = vor.u32 %v404_v17, %v403_v16  ;;  %v408_v49 = vshll.u32 %v407_v21, 23  ;;  %v3689_v32 = vadd.s32 4294967294, %v1222_v26  ;;  %vm1062_vm7 = vcmp.gt.s32.totalorder %v1061_v39, 0 }
  0xfd   :  { %v419_v59 = vsel %vm4240_vm4, 0, %v417_v20  ;;  %v1051_v50 = vand.u32 2147483647, %v4195_v12  ;;  %v1063_v61 = vsel %vm1062_vm7, %v1061_v39, 0  ;;  %v285_v2 = vadd.s32 1, %v4274_v46 }
  0xfe   :  { %v409_v34 = vor.u32 4788187, %v408_v49  ;;  %v412_v35 = vcvt.s32.f32 %v405_v27  ;;  %vm3690_vm6 = vcmp.lt.s32.totalorder %v3689_v32, 0  ;;  %v282_v4 = vmul.u32 %v4212_v37, %v266_v31 }
  0xff   :  { %v1225_v48 = vsel %vm3690_vm6, 0, %v3689_v32  ;;  %vm284_vm8 = vc.u32 %v4279_v54, %v4273_v41  ;;  %v1065_v36 = vand.u32 31, %v1063_v61  ;;  %v1241_v7 = vsel %vm1156_vm5, %v1240_v33, %v4214_v38 }
 0x100   :  { %v410_v30 = vand.u32 2147483647, %v409_v34  ;;  %v1226_v56 = vsub.s32 32, %v1225_v48  ;;  %v1230_v58 = vsub.s32 4294967266, %v1225_v48  ;;  %v1227_v62 = vshll.u32 %v4228_v60, %v1225_v48 }
 0x101   :  { %v286_v14 = vsel %vm284_vm8, %v285_v2, %v4274_v46  ;;  %v1058_v45 = vand.u32 8388607, %v1051_v50  ;;  %v1066_v37 = vsub.s32 32, %v1065_v36  ;;  %v2104_v16 = vadd.s32 3, %v419_v59 }
 0x102   :  { %v413_v42 = vmul.f32 %v412_v35, %v410_v30  ;;  %v1228_v63 = vshrl.u32 %v1210_v10, %v1226_v56  ;;  %v1231_v1 = vadd.s32 127, %v1230_v58  ;;  %v287_v10 = vadd.s32 %v286_v14, %v282_v4 }
 0x103   :  { %vm4304_vm9 = vcmp.le.f32.partialorder %v1154_v22, 0.7853982  ;;  %v4310_v8 = vand.u32 3, %v419_v59  ;;  %v1059_v11 = vor.u32 8388608, %v1058_v45  ;;  %v1075_v27 = vshrl.u32 %v4014_v55, %v1066_v37 }
 0x104   :  { %v414_v3 = vxor.u32 2147483648, %v413_v42  ;;  %v1229_v5 = vor.u32 %v1228_v63, %v1227_v62  ;;  %v1232_v6 = vshll.u32 %v1231_v1, 23  ;;  %v1243_v21 = vsel %vm4304_vm9, 0, %v1241_v7 }
 0x105   :  { %v288_v23 = vadd.s32 536870912, %v287_v10  ;;  %v4315_v22 = vand.u32 3, %v2104_v16  ;;  %v2936_v25 = vadd.s32 3, %v1243_v21  ;;  %v1072_v29 = vshrl.u32 %v4013_v53, %v1066_v37 }
 0x106   :  { %v415_v60 = vsel %vm332_vm14, %v414_v3, %v413_v42  ;;  %v1233_v38 = vor.u32 4788187, %v1232_v6  ;;  %v1236_v26 = vcvt.s32.f32 %v1229_v5  ;;  %v1074_v33 = vshll.u32 %v4013_v53, %v1065_v36 }
 0x107   :  { %v418_v15 = vsel %vm4240_vm4, %v4111_v18, %v415_v60  ;;  %v4312_v9 = vshrl.u32 %v288_v23, 30  ;;  %v1078_v13 = vshrl.u32 %v4015_v57, %v1066_v37  ;;  %v1081_v28 = vshrl.u32 %v4016_v0, %v1066_v37 }
 0x108   :  { %3903 = vcosq.f32 %v418_v15  ;;  %v1234_v20 = vand.u32 2147483647, %v1233_v38  ;;  %v4322_v35 = vshrl.u32 %v1063_v61, 5  ;;  %v1069_v43 = vshrl.u32 %v4012_v51, %v1066_v37 }
 0x109   :  { %3905 = vsinq.f32 %v418_v15  ;;  %v290_v32 = vshll.u32 %v4312_v9, 30  ;;  %v1071_v39 = vshll.u32 %v4012_v51, %v1065_v36  ;;  %v1076_v46 = vor.u32 %v1075_v27, %v1074_v33 }
 0x10a   :  { %v1237_v49 = vmul.f32 %v1236_v26, %v1234_v20  ;;  %v1077_v30 = vshll.u32 %v4014_v55, %v1065_v36  ;;  %v1080_v48 = vshll.u32 %v4015_v57, %v1065_v36  ;;  %vm428_vm10 = vcmp.eq.s32.totalorder %v4310_v8, 2 }
 0x10b   :  { %v4326_v40 = vsub.s32 %v287_v10, %v290_v32  ;;  %vm2110_vm11 = vcmp.eq.s32.totalorder %v4315_v22, 2  ;;  %v4334_v56 = vand.u32 3, %v1243_v21  ;;  %v1068_v58 = vshll.u32 %v4011_v47, %v1065_v36 }
 0x10c   :  { %v1238_v34 = vxor.u32 2147483648, %v1237_v49  ;;  %v1073_v31 = vor.u32 %v1072_v29, %v1071_v39  ;;  %vm425_vm12 = vcmp.eq.s32.totalorder %v4310_v8, 0  ;;  %vm2107_vm13 = vcmp.eq.s32.totalorder %v4315_v22, 0 }
 0x10d   :  { %v293_v59 = vsub.s32 0, %v4326_v40  ;;  %v1079_v61 = vor.u32 %v1078_v13, %v1077_v30  ;;  %v1082_v62 = vor.u32 %v1081_v28, %v1080_v48  ;;  %vm424_vm14 = vcmp.lt.s32.totalorder %v4310_v8, 2 }
 0x10e   :  { %v1239_v52 = vsel %vm1156_vm5, %v1238_v34, %v1237_v49  ;;  %vm2106_vm15 = vcmp.lt.s32.totalorder %v4315_v22, 2  ;;  %v4345_v63 = vand.u32 3, %v2936_v25  ;;  %v1070_v1 = vor.u32 %v1069_v43, %v1068_v58  ;;  %v4377_v25 = vpop.f32.mrf.mxu0 }
 0x10f   :  { %v1242_v42 = vsel %vm4304_vm9, %v4113_v19, %v1239_v52  ;;  %vm1086_vm0 = vcmp.lt.s32.totalorder %v4322_v35, 4  ;;  %vm422_vm1 = vweird.f32 %v4111_v18  ;;  %v3652_v2 = vmin.u32 %v293_v59, %v4326_v40 }
 0x110   :  { %3907 = vcosq.f32 %v1242_v42  ;;  %v1088_v3 = vsel %vm1086_vm0, %v1076_v46, 2102212464  ;;  %v4350_v4 = vshll.u32 %v1059_v11, 8  ;;  %v283_v36 = vadd.s32 %v4273_v41, %v4279_v54 }
 0x111   :  { %3909 = vsinq.f32 %v1242_v42  ;;  %v1067_v5 = vshrl.u32 %v4011_v47, %v1066_v37  ;;  %vm1083_vm2 = vcmp.lt.s32.totalorder %v4322_v35, 1  ;;  %vm1085_vm3 = vcmp.lt.s32.totalorder %v4322_v35, 3 }
 0x112   :  { %v295_v6 = vclz %v3652_v2  ;;  %v1092_v7 = vsel %vm1086_vm0, %v1079_v61, 920167782  ;;  %v1095_v14 = vsel %vm1083_vm2, %v1073_v31, %v1076_v46  ;;  %v1096_v60 = vsel %vm1086_vm0, %v1082_v62, 1326507024 }
 0x113   :  { %vm1084_vm4 = vcmp.lt.s32.totalorder %v4322_v35, 2  ;;  %v1087_v45 = vsel %vm1083_vm2, %v1067_v5, %v1070_v1  ;;  %v1089_v15 = vsel %vm1085_vm3, %v1073_v31, %v1088_v3  ;;  %v1097_v41 = vsel %vm1085_vm3, %v1079_v61, %v1096_v60 }
 0x114   :  { %vm229_vm5 = vcmp.lt.s32.totalorder %v4119_v24, 0  ;;  %v3653_v16 = vadd.s32 4294967294, %v295_v6  ;;  %v1091_v17 = vsel %vm1083_vm2, %v1070_v1, %v1073_v31  ;;  %v1098_v38 = vsel %vm1084_vm4, %v1095_v14, %v1097_v41 }
 0x115   :  { %v3904_v10 = vpop.eup %3903  ;;  %v1093_v23 = vsel %vm1085_vm3, %v1076_v46, %v1092_v7  ;;  %v4368_v20 = vmul.u32.u64.low %v4350_v4, %v1098_v38  ;;  %v4369_v26 = vmul.u32.u64.high %v4350_v4, %v1098_v38, %v4368_v20  ;;  %vm1252_vm6 = vcmp.eq.s32.totalorder %v4334_v56, 2 }
 0x116   :  { %v3906_v54 = vpop.eup %3905  ;;  %v429_v37 = vxor.u32 2147483648, %v3904_v10  ;;  %vm3654_vm7 = vcmp.lt.s32.totalorder %v3653_v16, 0  ;;  %v313_v49 = vsub.s32 4, %v4312_v9  ;;  %vm1249_vm8 = vcmp.eq.s32.totalorder %v4334_v56, 0 }
 0x117   :  { %v426_v21 = vxor.u32 2147483648, %v3906_v54  ;;  %v298_v33 = vsel %vm3654_vm7, 0, %v3653_v16  ;;  %v1090_v13 = vsel %vm1084_vm4, %v1087_v45, %v1089_v15  ;;  %vm1248_vm9 = vcmp.lt.s32.totalorder %v4334_v56, 2 }
 0x118   :  { %v430_v11 = vsel %vm428_vm10, %v429_v37, %v3906_v54  ;;  %v2112_v27 = vsel %vm2110_vm11, %v429_v37, %v3906_v54  ;;  %v299_v43 = vsub.s32 32, %v298_v33  ;;  %v1094_v39 = vsel %vm1084_vm4, %v1091_v17, %v1093_v23 }
 0x119   :  { %v427_v29 = vsel %vm425_vm12, %v3904_v10, %v426_v21  ;;  %v2109_v32 = vsel %vm2107_vm13, %v3904_v10, %v426_v21  ;;  %vm1246_vm10 = vweird.f32 %v4113_v19  ;;  %v303_v48 = vsub.s32 4294967266, %v298_v33 }
 0x11a   :  { %v431_v28 = vsel %vm424_vm14, %v427_v29, %v430_v11  ;;  %v2113_v34 = vsel %vm2106_vm15, %v2109_v32, %v2112_v27  ;;  %v539_v8 = vand.u32 2139095040, %v4377_v25  ;;  %v300_v58 = vshll.u32 %v4326_v40, %v298_v33 }
 0x11b   :  { %v432_v46 = vsel %vm422_vm1, nan, %v431_v28  ;;  %v2114_v30 = vsel %vm422_vm1, nan, %v2113_v34  ;;  %v301_v31 = vshrl.u32 %v283_v36, %v299_v43  ;;  %vm4402_vm11 = vcmp.le.f32.partialorder %v227_v44, 0.7853982 }
 0x11c   :  { %v1876_v52 = vmul.f32 0.088388346, %v432_v46  ;;  %v3572_v22 = vmul.f32 0.088388346, %v2114_v30  ;;  %v304_v42 = vadd.s32 127, %v303_v48  ;;  %v540_v61 = vshrl.u32 %v539_v8, 23 }
 0x11d   :  { %v4407_v18 = vmul.u32.u64.low %v4350_v4, %v1094_v39  ;;  %v4408_v59 = vmul.u32.u64.high %v4350_v4, %v1094_v39, %v4407_v18  ;;  %v3908_v62 = vpop.eup %3907  ;;  %vm2938_vm12 = vcmp.lt.s32.totalorder %v4345_v63, 2  ;;  %vm2939_vm13 = vcmp.eq.s32.totalorder %v4345_v63, 0 }
 0x11e   :  { %1892 = vst [vmem:[#allocation2 + $0x8] sm:$0xff] %v1876_v52  ;;  %3588 = vst [vmem:[#allocation4 + $0x8] sm:$0xff] %v3572_v22  ;;  %vm2942_vm14 = vcmp.eq.s32.totalorder %v4345_v63, 2  ;;  %v302_v44 = vor.u32 %v301_v31, %v300_v58  ;;  %v3910_v40 = vpop.eup %3909  ;;  %v1253_v1 = vxor.u32 2147483648, %v3908_v62  ;;  %v305_v2 = vshll.u32 %v304_v42, 23 }
 0x11f   :  { %v314_v3 = vsel %vm229_vm5, %v313_v49, %v4312_v9  ;;  %v1106_v36 = vmul.u32 %v4350_v4, %v1090_v13  ;;  %v1250_v5 = vxor.u32 2147483648, %v3910_v40  ;;  %vm1108_vm15 = vc.u32 %v4369_v26, %v4407_v18 }
 0x120   :  { %v536_v6 = vand.u32 2147483647, %v4377_v25  ;;  %v3663_v7 = vadd.s32 4294967169, %v540_v61  ;;  %v1254_v14 = vsel %vm1252_vm6, %v1253_v1, %v3910_v40  ;;  %v2944_v60 = vsel %vm2942_vm14, %v1253_v1, %v3910_v40 }
 0x121   :  { %v306_v10 = vor.u32 4788187, %v305_v2  ;;  %v1109_v45 = vadd.s32 1, %v4408_v59  ;;  %v1251_v15 = vsel %vm1249_vm8, %v3908_v62, %v1250_v5  ;;  %v2941_v9 = vsel %vm2939_vm13, %v3908_v62, %v1250_v5 }
 0x122   :  { %v309_v4 = vcvt.s32.f32 %v302_v44  ;;  %v546_v41 = vadd.s32 1, %v3663_v7  ;;  %v1255_v54 = vsel %vm1248_vm9, %v1251_v15, %v1254_v14  ;;  %v2945_v37 = vsel %vm2938_vm12, %v2941_v9, %v2944_v60  ;;  %v4463_v44 = vpop.f32.mrf.mxu1 }
 0x123   :  { %v307_v16 = vand.u32 2147483647, %v306_v10  ;;  %v1110_v17 = vsel %vm1108_vm15, %v1109_v45, %v4408_v59  ;;  %v1256_v38 = vsel %vm1246_vm10, nan, %v1255_v54  ;;  %v2946_v21 = vsel %vm1246_vm10, nan, %v2945_v37 }
 0x124   :  { %v1111_v23 = vadd.s32 %v1110_v17, %v1106_v36  ;;  %vm547_vm0 = vcmp.gt.s32.totalorder %v546_v41, 0  ;;  %v1884_v20 = vmul.f32 0.088388346, %v1256_v38  ;;  %v3580_v11 = vmul.f32 0.088388346, %v2946_v21 }
 0x125   :  { %v310_v27 = vmul.f32 %v309_v4, %v307_v16  ;;  %v548_v49 = vsel %vm547_vm0, %v546_v41, 0  ;;  %v316_v56 = vsel %vm4402_vm11, 0, %v314_v3  ;;  %v543_v34 = vand.u32 8388607, %v536_v6 }
 0x126   :  { %v1112_v63 = vadd.s32 536870912, %v1111_v23  ;;  %v550_v29 = vand.u32 31, %v548_v49  ;;  %1900 = vst [vmem:[#allocation2 + $0x48] sm:$0xff] %v1884_v20  ;;  %3596 = vst [vmem:[#allocation4 + $0x48] sm:$0xff] %v3580_v11  ;;  %v2000_v28 = vadd.s32 3, %v316_v56  ;;  %v4459_v42 = vand.u32 3, %v316_v56 }
 0x127   :  { %v311_v32 = vxor.u32 2147483648, %v310_v27  ;;  %v549_v61 = vshrl.u32 %v548_v49, 5  ;;  %v544_v36 = vor.u32 8388608, %v543_v34  ;;  %v1363_v60 = vand.u32 2139095040, %v4463_v44 }
 0x128   :  { %v4439_v33 = vshrl.u32 %v1112_v63, 30  ;;  %v551_v13 = vsub.s32 32, %v550_v29  ;;  %v553_v43 = vshll.u32 %v4011_v47, %v550_v29  ;;  %v556_v30 = vshll.u32 %v4012_v51, %v550_v29 }
 0x129   :  { %v312_v19 = vsel %vm229_vm5, %v311_v32, %v310_v27  ;;  %v559_v48 = vshll.u32 %v4013_v53, %v550_v29  ;;  %v562_v31 = vshll.u32 %v4014_v55, %v550_v29  ;;  %v4461_v59 = vand.u32 3, %v2000_v28 }
 0x12a   :  { %v315_v39 = vsel %vm4402_vm11, %v4119_v24, %v312_v19  ;;  %v1114_v46 = vshll.u32 %v4439_v33, 30  ;;  %v554_v8 = vshrl.u32 %v4012_v51, %v551_v13  ;;  %v557_v52 = vshrl.u32 %v4013_v53, %v551_v13 }
 0x12b   :  { %3911 = vcosq.f32 %v315_v39  ;;  %v560_v22 = vshrl.u32 %v4014_v55, %v551_v13  ;;  %v563_v35 = vshrl.u32 %v4015_v57, %v551_v13  ;;  %v565_v5 = vshll.u32 %v4015_v57, %v550_v29 }
 0x12c   :  { %3913 = vsinq.f32 %v315_v39  ;;  %v4455_v58 = vsub.s32 %v1111_v23, %v1114_v46  ;;  %v555_v62 = vor.u32 %v554_v8, %v553_v43  ;;  %v558_v1 = vor.u32 %v557_v52, %v556_v30 }
 0x12d   :  { %v561_v2 = vor.u32 %v560_v22, %v559_v48  ;;  %v564_v3 = vor.u32 %v563_v35, %v562_v31  ;;  %v566_v7 = vshrl.u32 %v4016_v0, %v551_v13  ;;  %v552_v10 = vshrl.u32 %v4011_v47, %v551_v13 }
 0x12e   :  { %v1117_v40 = vsub.s32 0, %v4455_v58  ;;  %vm568_vm1 = vcmp.lt.s32.totalorder %v549_v61, 1  ;;  %vm571_vm2 = vcmp.lt.s32.totalorder %v549_v61, 4  ;;  %vm325_vm3 = vcmp.eq.s32.totalorder %v4459_v42, 2 }
 0x12f   :  { %v567_v45 = vor.u32 %v566_v7, %v565_v5  ;;  %vm2006_vm4 = vcmp.eq.s32.totalorder %v4461_v59, 2  ;;  %v573_v9 = vsel %vm571_vm2, %v561_v2, 2102212464  ;;  %v576_v4 = vsel %vm568_vm1, %v555_v62, %v558_v1 }
 0x130   :  { %v3684_v14 = vmin.u32 %v1117_v40, %v4455_v58  ;;  %v577_v41 = vsel %vm571_vm2, %v564_v3, 920167782  ;;  %vm322_vm5 = vcmp.eq.s32.totalorder %v4459_v42, 0  ;;  %vm2003_vm6 = vcmp.eq.s32.totalorder %v4461_v59, 0 }
 0x131   :  { %vm569_vm7 = vcmp.lt.s32.totalorder %v549_v61, 2  ;;  %vm570_vm8 = vcmp.lt.s32.totalorder %v549_v61, 3  ;;  %v584_v54 = vshll.u32 %v544_v36, 8  ;;  %v1360_v37 = vand.u32 2147483647, %v4463_v44 }
 0x132   :  { %v1119_v15 = vclz %v3684_v14  ;;  %vm321_vm9 = vcmp.lt.s32.totalorder %v4459_v42, 2  ;;  %vm2002_vm10 = vcmp.lt.s32.totalorder %v4461_v59, 2  ;;  %vm1053_vm11 = vcmp.lt.s32.totalorder %v4195_v12, 0 }
 0x133   :  { %v572_v17 = vsel %vm568_vm1, %v552_v10, %v555_v62  ;;  %v578_v38 = vsel %vm570_vm8, %v561_v2, %v577_v41  ;;  %v580_v21 = vsel %vm568_vm1, %v558_v1, %v561_v2  ;;  %vm319_vm12 = vweird.f32 %v4119_v24 }
 0x134   :  { %v3685_v16 = vadd.s32 4294967294, %v1119_v15  ;;  %v574_v23 = vsel %vm570_vm8, %v558_v1, %v573_v9  ;;  %v579_v20 = vsel %vm569_vm7, %v576_v4, %v578_v38  ;;  %v581_v11 = vsel %vm571_vm2, %v567_v45, 1326507024 }
 0x135   :  { %v1364_v27 = vshrl.u32 %v1363_v60, 23  ;;  %v582_v49 = vsel %vm570_vm8, %v564_v3, %v581_v11  ;;  %v4490_v56 = vmul.u32.u64.low %v584_v54, %v579_v20  ;;  %v4491_v63 = vmul.u32.u64.high %v584_v54, %v579_v20, %v4490_v56 }
 0x136   :  { %vm3686_vm13 = vcmp.lt.s32.totalorder %v3685_v16, 0  ;;  %v1107_v29 = vadd.s32 %v4407_v18, %v4369_v26  ;;  %v583_v13 = vsel %vm569_vm7, %v580_v21, %v582_v49  ;;  %vm4499_vm14 = vcmp.le.f32.partialorder %v1051_v50, 0.7853982 }
 0x137   :  { %v1122_v32 = vsel %vm3686_vm13, 0, %v3685_v16  ;;  %v3695_v19 = vadd.s32 4294967169, %v1364_v27  ;;  %v1137_v46 = vsub.s32 4, %v4439_v33  ;;  %v575_v30 = vsel %vm569_vm7, %v572_v17, %v574_v23  ;;  %v4535_v23 = vpop.f32.mrf.mxu0 }
 0x138   :  { %v3912_v28 = vpop.eup %3911  ;;  %v1123_v43 = vsub.s32 32, %v1122_v32  ;;  %v1127_v39 = vsub.s32 4294967266, %v1122_v32  ;;  %v4505_v26 = vmul.u32.u64.low %v584_v54, %v583_v13  ;;  %v4506_v18 = vmul.u32.u64.high %v584_v54, %v583_v13, %v4505_v26 }
 0x139   :  { %v3914_v48 = vpop.eup %3913  ;;  %v326_v8 = vxor.u32 2147483648, %v3912_v28  ;;  %v1370_v52 = vadd.s32 1, %v3695_v19  ;;  %v1124_v31 = vshll.u32 %v4455_v58, %v1122_v32  ;;  %v594_v61 = vadd.s32 1, %v4491_v63 }
 0x13a   :  { %v323_v22 = vxor.u32 2147483648, %v3914_v48  ;;  %v1125_v35 = vshrl.u32 %v1107_v29, %v1123_v43  ;;  %v1128_v50 = vadd.s32 127, %v1127_v39  ;;  %v1138_v7 = vsel %vm1053_vm11, %v1137_v46, %v4439_v33 }
 0x13b   :  { %v327_v62 = vsel %vm325_vm3, %v326_v8, %v3914_v48  ;;  %v2008_v40 = vsel %vm2006_vm4, %v326_v8, %v3914_v48  ;;  %vm1371_vm15 = vcmp.gt.s32.totalorder %v1370_v52, 0  ;;  %vm593_vm0 = vc.u32 %v4506_v18, %v4490_v56 }
 0x13c   :  { %v324_v1 = vsel %vm322_vm5, %v3912_v28, %v323_v22  ;;  %v2005_v2 = vsel %vm2003_vm6, %v3912_v28, %v323_v22  ;;  %v1126_v3 = vor.u32 %v1125_v35, %v1124_v31  ;;  %v1129_v36 = vshll.u32 %v1128_v50, 23 }
 0x13d   :  { %v328_v58 = vsel %vm321_vm9, %v324_v1, %v327_v62  ;;  %v2009_v5 = vsel %vm2002_vm10, %v2005_v2, %v2008_v40  ;;  %v591_v45 = vmul.u32 %v584_v54, %v575_v30  ;;  %v595_v59 = vsel %vm593_vm0, %v594_v61, %v4491_v63 }
 0x13e   :  { %v329_v14 = vsel %vm319_vm12, nan, %v328_v58  ;;  %v2010_v60 = vsel %vm319_vm12, nan, %v2009_v5  ;;  %v1130_v10 = vor.u32 4788187, %v1129_v36  ;;  %v1372_v9 = vsel %vm1371_vm15, %v1370_v52, 0 }
 0x13f   :  { %v1875_v42 = vmul.f32 0.088388346, %v329_v14  ;;  %v3571_v15 = vmul.f32 0.088388346, %v2010_v60  ;;  %v1133_v41 = vcvt.s32.f32 %v1126_v3  ;;  %v596_v33 = vadd.s32 %v595_v59, %v591_v45 }
 0x140   :  { %v1131_v4 = vand.u32 2147483647, %v1130_v10  ;;  %v1374_v16 = vand.u32 31, %v1372_v9  ;;  %v1140_v17 = vsel %vm4499_vm14, 0, %v1138_v7  ;;  %v1367_v54 = vand.u32 8388607, %v1360_v37 }
 0x141   :  { %1891 = vst [vmem:[#allocation2] sm:$0xff] %v1875_v42  ;;  %3587 = vst [vmem:[#allocation4] sm:$0xff] %v3571_v15  ;;  %v597_v24 = vadd.s32 536870912, %v596_v33  ;;  %v2832_v11 = vadd.s32 3, %v1140_v17  ;;  %v4541_v49 = vshrl.u32 %v1372_v9, 5  ;;  %v436_v13 = vand.u32 2139095040, %v4535_v23 }
 0x142   :  { %v1134_v38 = vmul.f32 %v1133_v41, %v1131_v4  ;;  %v1375_v21 = vsub.s32 32, %v1374_v16  ;;  %v1377_v30 = vshll.u32 %v4011_v47, %v1374_v16  ;;  %v1380_v48 = vshll.u32 %v4012_v51, %v1374_v16 }
 0x143   :  { %v4539_v27 = vshrl.u32 %v597_v24, 30  ;;  %v1386_v8 = vshll.u32 %v4014_v55, %v1374_v16  ;;  %v1383_v52 = vshll.u32 %v4013_v53, %v1374_v16  ;;  %v1389_v22 = vshll.u32 %v4015_v57, %v1374_v16 }
 0x144   :  { %v1135_v20 = vxor.u32 2147483648, %v1134_v38  ;;  %v1378_v63 = vshrl.u32 %v4012_v51, %v1375_v21  ;;  %v1381_v29 = vshrl.u32 %v4013_v53, %v1375_v21  ;;  %v1387_v32 = vshrl.u32 %v4015_v57, %v1375_v21 }
 0x145   :  { %v599_v28 = vshll.u32 %v4539_v27, 30  ;;  %v1384_v43 = vshrl.u32 %v4014_v55, %v1375_v21  ;;  %v1390_v39 = vshrl.u32 %v4016_v0, %v1375_v21  ;;  %v4563_v61 = vand.u32 3, %v1140_v17 }
 0x146   :  { %v1136_v19 = vsel %vm1053_vm11, %v1135_v20, %v1134_v38  ;;  %v1379_v31 = vor.u32 %v1378_v63, %v1377_v30  ;;  %v1382_v35 = vor.u32 %v1381_v29, %v1380_v48  ;;  %v1388_v50 = vor.u32 %v1387_v32, %v1386_v8 }
 0x147   :  { %v1139_v46 = vsel %vm4499_vm14, %v4195_v12, %v1136_v19  ;;  %v4558_v26 = vsub.s32 %v596_v33, %v599_v28  ;;  %v1385_v62 = vor.u32 %v1384_v43, %v1383_v52  ;;  %v1391_v40 = vor.u32 %v1390_v39, %v1389_v22 }
 0x148   :  { %3915 = vcosq.f32 %v1139_v46  ;;  %v4565_v1 = vand.u32 3, %v2832_v11  ;;  %v1368_v2 = vor.u32 8388608, %v1367_v54  ;;  %v1376_v36 = vshrl.u32 %v4011_v47, %v1375_v21 }
 0x149   :  { %3917 = vsinq.f32 %v1139_v46  ;;  %v602_v34 = vsub.s32 0, %v4558_v26  ;;  %vm1392_vm1 = vcmp.lt.s32.totalorder %v4541_v49, 1  ;;  %vm1395_vm2 = vcmp.lt.s32.totalorder %v4541_v49, 4 }
 0x14a   :  { %vm1394_vm3 = vcmp.lt.s32.totalorder %v4541_v49, 3  ;;  %v1400_v58 = vsel %vm1392_vm1, %v1379_v31, %v1382_v35  ;;  %v1401_v5 = vsel %vm1395_vm2, %v1388_v50, 920167782  ;;  %v437_v7 = vshrl.u32 %v436_v13, 23 }
 0x14b   :  { %v3664_v3 = vmin.u32 %v602_v34, %v4558_v26  ;;  %vm538_vm4 = vcmp.lt.s32.totalorder %v4377_v25, 0  ;;  %v1402_v60 = vsel %vm1394_vm3, %v1385_v62, %v1401_v5  ;;  %v1404_v10 = vsel %vm1392_vm1, %v1382_v35, %v1385_v62 }
 0x14c   :  { %v1405_v45 = vsel %vm1395_vm2, %v1391_v40, 1326507024  ;;  %vm1149_vm5 = vcmp.eq.s32.totalorder %v4563_v61, 2  ;;  %vm1393_vm6 = vcmp.lt.s32.totalorder %v4541_v49, 2  ;;  %v1397_v42 = vsel %vm1395_vm2, %v1385_v62, 2102212464 }
 0x14d   :  { %v604_v14 = vclz %v3664_v3  ;;  %v1408_v15 = vshll.u32 %v1368_v2, 8  ;;  %vm1146_vm7 = vcmp.eq.s32.totalorder %v4563_v61, 0  ;;  %v1396_v9 = vsel %vm1392_vm1, %v1376_v36, %v1379_v31 }
 0x14e   :  { %v1403_v4 = vsel %vm1393_vm6, %v1400_v58, %v1402_v60  ;;  %v1406_v41 = vsel %vm1394_vm3, %v1388_v50, %v1405_v45  ;;  %vm1145_vm8 = vcmp.lt.s32.totalorder %v4563_v61, 2  ;;  %vm2834_vm9 = vcmp.lt.s32.totalorder %v4565_v1, 2 }
 0x14f   :  { %v3665_v59 = vadd.s32 4294967294, %v604_v14  ;;  %vm4592_vm10 = vcmp.le.f32.partialorder %v536_v6, 0.7853982  ;;  %v1407_v16 = vsel %vm1393_vm6, %v1404_v10, %v1406_v41  ;;  %v3659_v24 = vadd.s32 4294967169, %v437_v7 }
 0x150   :  { %v4598_v17 = vmul.u32.u64.low %v1408_v15, %v1403_v4  ;;  %v4599_v38 = vmul.u32.u64.high %v1408_v15, %v1403_v4, %v4598_v17  ;;  %vm1143_vm11 = vweird.f32 %v4195_v12  ;;  %v1398_v21 = vsel %vm1394_vm3, %v1382_v35, %v1397_v42  ;;  %v4642_v42 = vpop.f32.mrf.mxu1 }
 0x151   :  { %vm3666_vm12 = vcmp.lt.s32.totalorder %v3665_v59, 0  ;;  %v4605_v54 = vmul.u32.u64.low %v1408_v15, %v1407_v16  ;;  %v4606_v20 = vmul.u32.u64.high %v1408_v15, %v1407_v16, %v4605_v54  ;;  %vm2835_vm13 = vcmp.eq.s32.totalorder %v4565_v1, 0 }
 0x152   :  { %v607_v6 = vsel %vm3666_vm12, 0, %v3665_v59  ;;  %v622_v11 = vsub.s32 4, %v4539_v27  ;;  %v443_v63 = vadd.s32 1, %v3659_v24  ;;  %vm2838_vm14 = vcmp.eq.s32.totalorder %v4565_v1, 2 }
 0x153   :  { %v592_v29 = vadd.s32 %v4490_v56, %v4506_v18  ;;  %v608_v32 = vsub.s32 32, %v607_v6  ;;  %v612_v13 = vsub.s32 4294967266, %v607_v6  ;;  %v1399_v28 = vsel %vm1393_vm6, %v1396_v9, %v1398_v21 }
 0x154   :  { %v1418_v43 = vadd.s32 1, %v4599_v38  ;;  %v433_v39 = vand.u32 2147483647, %v4535_v23  ;;  %vm444_vm15 = vcmp.gt.s32.totalorder %v443_v63, 0  ;;  %v609_v48 = vshll.u32 %v4558_v26, %v607_v6 }
 0x155   :  { %v3916_v19 = vpop.eup %3915  ;;  %v610_v8 = vshrl.u32 %v592_v29, %v608_v32  ;;  %v613_v52 = vadd.s32 127, %v612_v13  ;;  %v623_v56 = vsel %vm538_vm4, %v622_v11, %v4539_v27  ;;  %vm1417_vm0 = vc.u32 %v4606_v20, %v4598_v17 }
 0x156   :  { %v3918_v46 = vpop.eup %3917  ;;  %v1150_v30 = vxor.u32 2147483648, %v3916_v19  ;;  %v445_v18 = vsel %vm444_vm15, %v443_v63, 0  ;;  %v1415_v62 = vmul.u32 %v1408_v15, %v1399_v28  ;;  %v1419_v27 = vsel %vm1417_vm0, %v1418_v43, %v4599_v38 }
 0x157   :  { %v1147_v22 = vxor.u32 2147483648, %v3918_v46  ;;  %v611_v35 = vor.u32 %v610_v8, %v609_v48  ;;  %v614_v50 = vshll.u32 %v613_v52, 23  ;;  %v625_v36 = vsel %vm4592_vm10, 0, %v623_v56 }
 0x158   :  { %v1151_v49 = vsel %vm1149_vm5, %v1150_v30, %v3918_v46  ;;  %v2840_v31 = vsel %vm2838_vm14, %v1150_v30, %v3918_v46  ;;  %v1420_v7 = vadd.s32 %v1419_v27, %v1415_v62  ;;  %v447_v14 = vand.u32 31, %v445_v18 }
 0x159   :  { %v1148_v26 = vsel %vm1146_vm7, %v3916_v19, %v1147_v22  ;;  %v2837_v34 = vsel %vm2835_vm13, %v3916_v19, %v1147_v22  ;;  %v615_v3 = vor.u32 4788187, %v614_v50  ;;  %v618_v61 = vcvt.s32.f32 %v611_v35 }
 0x15a   :  { %v1152_v40 = vsel %vm1145_vm8, %v1148_v26, %v1151_v49  ;;  %v2841_v2 = vsel %vm2834_vm9, %v2837_v34, %v2840_v31  ;;  %v1421_v1 = vadd.s32 536870912, %v1420_v7  ;;  %v448_v15 = vsub.s32 32, %v447_v14 }
 0x15b   :  { %v1153_v58 = vsel %vm1143_vm11, nan, %v1152_v40  ;;  %v2842_v5 = vsel %vm1143_vm11, nan, %v2841_v2  ;;  %v616_v45 = vand.u32 2147483647, %v615_v3  ;;  %v440_v9 = vand.u32 8388607, %v433_v39 }
 0x15c   :  { %v1883_v60 = vmul.f32 0.088388346, %v1153_v58  ;;  %v3579_v10 = vmul.f32 0.088388346, %v2842_v5  ;;  %v2312_v4 = vadd.s32 3, %v625_v36  ;;  %v4646_v41 = vshrl.u32 %v1421_v1, 30 }
 0x15d   :  { %v619_v59 = vmul.f32 %v618_v61, %v616_v45  ;;  %v451_v12 = vshrl.u32 %v4012_v51, %v448_v15  ;;  %v1260_v16 = vand.u32 2139095040, %v4642_v42  ;;  %v454_v24 = vshrl.u32 %v4013_v53, %v448_v15 }
 0x15e   :  { %1899 = vst [vmem:[#allocation2 + $0x40] sm:$0xff] %v1883_v60  ;;  %3595 = vst [vmem:[#allocation4 + $0x40] sm:$0xff] %v3579_v10  ;;  %v457_v21 = vshrl.u32 %v4014_v55, %v448_v15  ;;  %v460_v54 = vshrl.u32 %v4015_v57, %v448_v15  ;;  %v1423_v6 = vshll.u32 %v4646_v41, 30  ;;  %v446_v11 = vshrl.u32 %v445_v18, 5 }
 0x15f   :  { %v620_v38 = vxor.u32 2147483648, %v619_v59  ;;  %v450_v63 = vshll.u32 %v4011_v47, %v447_v14  ;;  %v463_v29 = vshrl.u32 %v4016_v0, %v448_v15  ;;  %v453_v13 = vshll.u32 %v4012_v51, %v447_v14 }
 0x160   :  { %v456_v19 = vshll.u32 %v4013_v53, %v447_v14  ;;  %v459_v28 = vshll.u32 %v4014_v55, %v447_v14  ;;  %v4664_v46 = vsub.s32 %v1420_v7, %v1423_v6  ;;  %v462_v48 = vshll.u32 %v4015_v57, %v447_v14 }
 0x161   :  { %v621_v32 = vsel %vm538_vm4, %v620_v38, %v619_v59  ;;  %v452_v30 = vor.u32 %v451_v12, %v450_v63  ;;  %v455_v8 = vor.u32 %v454_v24, %v453_v13  ;;  %v4668_v49 = vand.u32 3, %v625_v36 }
 0x162   :  { %v624_v43 = vsel %vm4592_vm10, %v4377_v25, %v621_v32  ;;  %v458_v52 = vor.u32 %v457_v21, %v456_v19  ;;  %v461_v22 = vor.u32 %v460_v54, %v459_v28  ;;  %v1426_v56 = vsub.s32 0, %v4664_v46 }
 0x163   :  { %3919 = vcosq.f32 %v624_v43  ;;  %v464_v18 = vor.u32 %v463_v29, %v462_v48  ;;  %v4670_v31 = vand.u32 3, %v2312_v4  ;;  %v441_v35 = vor.u32 8388608, %v440_v9 }
 0x164   :  { %3921 = vsinq.f32 %v624_v43  ;;  %v449_v33 = vshrl.u32 %v4011_v47, %v448_v15  ;;  %vm1362_vm1 = vcmp.lt.s32.totalorder %v4463_v44, 0  ;;  %v3696_v50 = vmin.u32 %v1426_v56, %v4664_v46 }
 0x165   :  { %vm465_vm2 = vcmp.lt.s32.totalorder %v446_v11, 1  ;;  %vm467_vm3 = vcmp.lt.s32.totalorder %v446_v11, 3  ;;  %vm468_vm4 = vcmp.lt.s32.totalorder %v446_v11, 4  ;;  %v1261_v27 = vshrl.u32 %v1260_v16, 23 }
 0x166   :  { %v470_v26 = vsel %vm468_vm4, %v458_v52, 2102212464  ;;  %v473_v34 = vsel %vm465_vm2, %v452_v30, %v455_v8  ;;  %v474_v62 = vsel %vm468_vm4, %v461_v22, 920167782  ;;  %v1428_v40 = vclz %v3696_v50 }
 0x167   :  { %v475_v2 = vsel %vm467_vm3, %v458_v52, %v474_v62  ;;  %v477_v3 = vsel %vm465_vm2, %v455_v8, %v458_v52  ;;  %v478_v36 = vsel %vm468_vm4, %v464_v18, 1326507024  ;;  %vm466_vm5 = vcmp.lt.s32.totalorder %v446_v11, 2 }
 0x168   :  { %v469_v58 = vsel %vm465_vm2, %v449_v33, %v452_v30  ;;  %v471_v5 = vsel %vm467_vm3, %v455_v8, %v470_v26  ;;  %v481_v7 = vshll.u32 %v441_v35, 8  ;;  %vm634_vm6 = vcmp.eq.s32.totalorder %v4668_v49, 2 }
 0x169   :  { %vm4680_vm7 = vcmp.le.f32.partialorder %v1360_v37, 0.7853982  ;;  %v3697_v60 = vadd.s32 4294967294, %v1428_v40  ;;  %v1446_v10 = vsub.s32 4, %v4646_v41  ;;  %v476_v45 = vsel %vm466_vm5, %v473_v34, %v475_v2 }
 0x16a   :  { %v479_v61 = vsel %vm467_vm3, %v461_v22, %v478_v36  ;;  %vm631_vm8 = vcmp.eq.s32.totalorder %v4668_v49, 0  ;;  %v4689_v15 = vmul.u32.u64.low %v481_v7, %v476_v45  ;;  %v4690_v59 = vmul.u32.u64.high %v481_v7, %v476_v45, %v4689_v15 }
 0x16b   :  { %v480_v1 = vsel %vm466_vm5, %v477_v3, %v479_v61  ;;  %v3691_v9 = vadd.s32 4294967169, %v1261_v27  ;;  %vm630_vm9 = vcmp.lt.s32.totalorder %v4668_v49, 2  ;;  %vm3698_vm10 = vcmp.lt.s32.totalorder %v3697_v60, 0 }
 0x16c   :  { %v472_v37 = vsel %vm466_vm5, %v469_v58, %v471_v5  ;;  %v4695_v4 = vmul.u32.u64.low %v481_v7, %v480_v1  ;;  %v4696_v12 = vmul.u32.u64.high %v481_v7, %v480_v1, %v4695_v4  ;;  %vm628_vm11 = vweird.f32 %v4377_v25 }
 0x16d   :  { %vm2314_vm12 = vcmp.lt.s32.totalorder %v4670_v31, 2  ;;  %vm2315_vm13 = vcmp.eq.s32.totalorder %v4670_v31, 0  ;;  %v1431_v16 = vsel %vm3698_vm10, 0, %v3697_v60  ;;  %v1267_v38 = vadd.s32 1, %v3691_v9 }
 0x16e   :  { %v1416_v24 = vadd.s32 %v4598_v17, %v4606_v20  ;;  %v1432_v21 = vsub.s32 32, %v1431_v16  ;;  %v1436_v54 = vsub.s32 4294967266, %v1431_v16  ;;  %v1257_v6 = vand.u32 2147483647, %v4642_v42 }
 0x16f   :  { %v1447_v11 = vsel %vm1362_vm1, %v1446_v10, %v4646_v41  ;;  %v488_v63 = vmul.u32 %v481_v7, %v472_v37  ;;  %v491_v29 = vadd.s32 1, %v4690_v59  ;;  %vm1268_vm14 = vcmp.gt.s32.totalorder %v1267_v38, 0 }
 0x170   :  { %v3920_v32 = vpop.eup %3919  ;;  %v1433_v13 = vshll.u32 %v4664_v46, %v1431_v16  ;;  %v1434_v19 = vshrl.u32 %v1416_v24, %v1432_v21  ;;  %v1437_v28 = vadd.s32 127, %v1436_v54  ;;  %vm490_vm15 = vc.u32 %v4696_v12, %v4689_v15 }
 0x171   :  { %v3922_v17 = vpop.eup %3921  ;;  %v635_v20 = vxor.u32 2147483648, %v3920_v32  ;;  %vm2318_vm0 = vcmp.eq.s32.totalorder %v4670_v31, 2  ;;  %v492_v43 = vsel %vm490_vm15, %v491_v29, %v4690_v59  ;;  %v1269_v30 = vsel %vm1268_vm14, %v1267_v38, 0 }
 0x172   :  { %v632_v41 = vxor.u32 2147483648, %v3922_v17  ;;  %v1435_v48 = vor.u32 %v1434_v19, %v1433_v13  ;;  %v1438_v8 = vshll.u32 %v1437_v28, 23  ;;  %v493_v52 = vadd.s32 %v492_v43, %v488_v63  ;;  %v4751_v13 = vpop.f32.mrf.mxu0 }
 0x173   :  { %v636_v22 = vsel %vm634_vm6, %v635_v20, %v3922_v17  ;;  %v2320_v46 = vsel %vm2318_vm0, %v635_v20, %v3922_v17  ;;  %v1449_v56 = vsel %vm4680_vm7, 0, %v1447_v11  ;;  %v1271_v18 = vand.u32 31, %v1269_v30 }
 0x174   :  { %v633_v35 = vsel %vm631_vm8, %v3920_v32, %v632_v41  ;;  %v2317_v33 = vsel %vm2315_vm13, %v3920_v32, %v632_v41  ;;  %v1439_v50 = vor.u32 4788187, %v1438_v8  ;;  %v1264_v26 = vand.u32 8388607, %v1257_v6 }
 0x175   :  { %v637_v34 = vsel %vm630_vm9, %v633_v35, %v636_v22  ;;  %v2321_v62 = vsel %vm2314_vm12, %v2317_v33, %v2320_v46  ;;  %v494_v27 = vadd.s32 536870912, %v493_v52  ;;  %v1272_v40 = vsub.s32 32, %v1271_v18 }
 0x176   :  { %v638_v2 = vsel %vm628_vm11, nan, %v637_v34  ;;  %v2322_v3 = vsel %vm628_vm11, nan, %v2321_v62  ;;  %v1440_v36 = vand.u32 2147483647, %v1439_v50  ;;  %v1442_v58 = vcvt.s32.f32 %v1435_v48 }
 0x177   :  { %v1878_v5 = vmul.f32 0.088388346, %v638_v2  ;;  %v3574_v7 = vmul.f32 0.088388346, %v2322_v3  ;;  %v4731_v60 = vshrl.u32 %v494_v27, 30  ;;  %v3144_v49 = vadd.s32 3, %v1449_v56 }
 0x178   :  { %v1443_v10 = vmul.f32 %v1442_v58, %v1440_v36  ;;  %v1275_v45 = vshrl.u32 %v4012_v51, %v1272_v40  ;;  %v1265_v1 = vor.u32 8388608, %v1264_v26  ;;  %v1278_v59 = vshrl.u32 %v4013_v53, %v1272_v40 }
 0x179   :  { %1894 = vst [vmem:[#allocation2 + $0x18] sm:$0xff] %v1878_v5  ;;  %3590 = vst [vmem:[#allocation4 + $0x18] sm:$0xff] %v3574_v7  ;;  %v496_v31 = vshll.u32 %v4731_v60, 30  ;;  %v1281_v25 = vshrl.u32 %v4014_v55, %v1272_v40  ;;  %v1270_v37 = vshrl.u32 %v1269_v30, 5  ;;  %v1274_v4 = vshll.u32 %v4011_v47, %v1271_v18 }
 0x17a   :  { %v1444_v61 = vxor.u32 2147483648, %v1443_v10  ;;  %v1284_v16 = vshrl.u32 %v4015_v57, %v1272_v40  ;;  %v1277_v24 = vshll.u32 %v4012_v51, %v1271_v18  ;;  %v1280_v21 = vshll.u32 %v4013_v53, %v1271_v18 }
 0x17b   :  { %v4737_v9 = vsub.s32 %v493_v52, %v496_v31  ;;  %v1287_v54 = vshrl.u32 %v4016_v0, %v1272_v40  ;;  %v1276_v29 = vor.u32 %v1275_v45, %v1274_v4  ;;  %v1283_v32 = vshll.u32 %v4014_v55, %v1271_v18 }
 0x17c   :  { %v1445_v38 = vsel %vm1362_vm1, %v1444_v61, %v1443_v10  ;;  %v1279_v19 = vor.u32 %v1278_v59, %v1277_v24  ;;  %v1282_v28 = vor.u32 %v1281_v25, %v1280_v21  ;;  %v1286_v17 = vshll.u32 %v4015_v57, %v1271_v18 }
 0x17d   :  { %v1448_v11 = vsel %vm4680_vm7, %v4463_v44, %v1445_v38  ;;  %v499_v63 = vsub.s32 0, %v4737_v9  ;;  %v1285_v43 = vor.u32 %v1284_v16, %v1283_v32  ;;  %v4755_v30 = vand.u32 3, %v1449_v56 }
 0x17e   :  { %3923 = vcosq.f32 %v1448_v11  ;;  %v4757_v14 = vand.u32 3, %v3144_v49  ;;  %v1288_v41 = vor.u32 %v1287_v54, %v1286_v17  ;;  %v745_v48 = vand.u32 2139095040, %v4751_v13 }
 0x17f   :  { %3925 = vsinq.f32 %v1448_v11  ;;  %v3660_v20 = vmin.u32 %v499_v63, %v4737_v9  ;;  %vm1289_vm1 = vcmp.lt.s32.totalorder %v1270_v37, 1  ;;  %vm1292_vm2 = vcmp.lt.s32.totalorder %v1270_v37, 4 }
 0x180   :  { %v1305_v52 = vshll.u32 %v1265_v1, 8  ;;  %v1273_v22 = vshrl.u32 %v4011_v47, %v1272_v40  ;;  %vm1290_vm3 = vcmp.lt.s32.totalorder %v1270_v37, 2  ;;  %v1294_v46 = vsel %vm1292_vm2, %v1282_v28, 2102212464 }
 0x181   :  { %v501_v8 = vclz %v3660_v20  ;;  %v1297_v18 = vsel %vm1289_vm1, %v1276_v29, %v1279_v19  ;;  %vm1291_vm4 = vcmp.lt.s32.totalorder %v1270_v37, 3  ;;  %v1298_v33 = vsel %vm1292_vm2, %v1285_v43, 920167782 }
 0x182   :  { %v1301_v50 = vsel %vm1289_vm1, %v1279_v19, %v1282_v28  ;;  %vm435_vm5 = vcmp.lt.s32.totalorder %v4535_v23, 0  ;;  %v1293_v56 = vsel %vm1289_vm1, %v1273_v22, %v1276_v29  ;;  %v1299_v26 = vsel %vm1291_vm4, %v1282_v28, %v1298_v33 }
 0x183   :  { %v3661_v35 = vadd.s32 4294967294, %v501_v8  ;;  %v1302_v34 = vsel %vm1292_vm2, %v1288_v41, 1326507024  ;;  %v746_v62 = vshrl.u32 %v745_v48, 23  ;;  %vm1458_vm6 = vcmp.eq.s32.totalorder %v4755_v30, 2 }
 0x184   :  { %v1295_v27 = vsel %vm1291_vm4, %v1279_v19, %v1294_v46  ;;  %v1300_v2 = vsel %vm1290_vm3, %v1297_v18, %v1299_v26  ;;  %v1303_v40 = vsel %vm1291_vm4, %v1285_v43, %v1302_v34  ;;  %vm1455_vm8 = vcmp.eq.s32.totalorder %v4755_v30, 0 }
 0x185   :  { %vm3662_vm7 = vcmp.lt.s32.totalorder %v3661_v35, 0  ;;  %v1304_v36 = vsel %vm1290_vm3, %v1301_v50, %v1303_v40  ;;  %v4766_v58 = vmul.u32.u64.low %v1305_v52, %v1300_v2  ;;  %v4767_v5 = vmul.u32.u64.high %v1305_v52, %v1300_v2, %v4766_v58 }
 0x186   :  { %v504_v3 = vsel %vm3662_vm7, 0, %v3661_v35  ;;  %vm1454_vm9 = vcmp.lt.s32.totalorder %v4755_v30, 2  ;;  %vm4773_vm10 = vcmp.le.f32.partialorder %v433_v39, 0.7853982  ;;  %v489_v10 = vadd.s32 %v4689_v15, %v4696_v12 }
 0x187   :  { %v505_v49 = vsub.s32 32, %v504_v3  ;;  %v509_v31 = vsub.s32 4294967266, %v504_v3  ;;  %v3671_v45 = vadd.s32 4294967169, %v746_v62  ;;  %vm1452_vm11 = vweird.f32 %v4463_v44 }
 0x188   :  { %v519_v61 = vsub.s32 4, %v4731_v60  ;;  %v1296_v1 = vsel %vm1290_vm3, %v1293_v56, %v1295_v27  ;;  %v4782_v59 = vmul.u32.u64.low %v1305_v52, %v1304_v36  ;;  %v4783_v25 = vmul.u32.u64.high %v1305_v52, %v1304_v36, %v4782_v59 }
 0x189   :  { %v506_v39 = vshll.u32 %v4737_v9, %v504_v3  ;;  %v507_v4 = vshrl.u32 %v489_v10, %v505_v49  ;;  %v510_v16 = vadd.s32 127, %v509_v31  ;;  %v752_v38 = vadd.s32 1, %v3671_v45 }
 0x18a   :  { %vm3146_vm12 = vcmp.lt.s32.totalorder %v4757_v14, 2  ;;  %vm3147_vm13 = vcmp.eq.s32.totalorder %v4757_v14, 0  ;;  %vm3150_vm14 = vcmp.eq.s32.totalorder %v4757_v14, 2  ;;  %v1315_v15 = vadd.s32 1, %v4767_v5 }
 0x18b   :  { %v3924_v12 = vpop.eup %3923  ;;  %v508_v24 = vor.u32 %v507_v4, %v506_v39  ;;  %v511_v37 = vshll.u32 %v510_v16, 23  ;;  %v742_v21 = vand.u32 2147483647, %v4751_v13  ;;  %vm753_vm15 = vcmp.gt.s32.totalorder %v752_v38, 0  ;;  %v4838_v16 = vpop.f32.mrf.mxu1 }
 0x18c   :  { %v3926_v54 = vpop.eup %3925  ;;  %v1459_v11 = vxor.u32 2147483648, %v3924_v12  ;;  %v1312_v9 = vmul.u32 %v1305_v52, %v1296_v1  ;;  %vm1314_vm0 = vc.u32 %v4783_v25, %v4766_v58  ;;  %v754_v63 = vsel %vm753_vm15, %v752_v38, 0 }
 0x18d   :  { %v1456_v29 = vxor.u32 2147483648, %v3926_v54  ;;  %v512_v32 = vor.u32 4788187, %v511_v37  ;;  %v520_v19 = vsel %vm435_vm5, %v519_v61, %v4731_v60  ;;  %v1316_v28 = vsel %vm1314_vm0, %v1315_v15, %v4767_v5 }
 0x18e   :  { %v1460_v17 = vsel %vm1458_vm6, %v1459_v11, %v3926_v54  ;;  %v3152_v20 = vsel %vm3150_vm14, %v1459_v11, %v3926_v54  ;;  %v515_v43 = vcvt.s32.f32 %v508_v24  ;;  %v1317_v41 = vadd.s32 %v1316_v28, %v1312_v9 }
 0x18f   :  { %v1457_v48 = vsel %vm1455_vm8, %v3924_v12, %v1456_v29  ;;  %v3149_v8 = vsel %vm3147_vm13, %v3924_v12, %v1456_v29  ;;  %v513_v52 = vand.u32 2147483647, %v512_v32  ;;  %v756_v22 = vand.u32 31, %v754_v63 }
 0x190   :  { %v1461_v60 = vsel %vm1454_vm9, %v1457_v48, %v1460_v17  ;;  %v3153_v46 = vsel %vm3146_vm12, %v3149_v8, %v3152_v20  ;;  %v522_v18 = vsel %vm4773_vm10, 0, %v520_v19  ;;  %v1318_v35 = vadd.s32 536870912, %v1317_v41 }
 0x191   :  { %v1462_v33 = vsel %vm1452_vm11, nan, %v1461_v60  ;;  %v3154_v50 = vsel %vm1452_vm11, nan, %v3153_v46  ;;  %v516_v56 = vmul.f32 %v515_v43, %v513_v52  ;;  %v757_v26 = vsub.s32 32, %v756_v22 }
 0x192   :  { %v1886_v34 = vmul.f32 0.088388346, %v1462_v33  ;;  %v3582_v62 = vmul.f32 0.088388346, %v3154_v50  ;;  %v4815_v27 = vshrl.u32 %v1318_v35, 30  ;;  %v2208_v14 = vadd.s32 3, %v522_v18 }
 0x193   :  { %v517_v30 = vxor.u32 2147483648, %v516_v56  ;;  %v760_v40 = vshrl.u32 %v4012_v51, %v757_v26  ;;  %v749_v44 = vand.u32 8388607, %v742_v21  ;;  %v763_v36 = vshrl.u32 %v4013_v53, %v757_v26 }
 0x194   :  { %1902 = vst [vmem:[#allocation2 + $0x58] sm:$0xff] %v1886_v34  ;;  %3598 = vst [vmem:[#allocation4 + $0x58] sm:$0xff] %v3582_v62  ;;  %v1320_v2 = vshll.u32 %v4815_v27, 30  ;;  %v766_v5 = vshrl.u32 %v4014_v55, %v757_v26  ;;  %v4830_v31 = vshrl.u32 %v754_v63, 5  ;;  %v759_v45 = vshll.u32 %v4011_v47, %v756_v22 }
 0x195   :  { %v518_v3 = vsel %vm435_vm5, %v517_v30, %v516_v56  ;;  %v762_v61 = vshll.u32 %v4012_v51, %v756_v22  ;;  %v765_v1 = vshll.u32 %v4013_v53, %v756_v22  ;;  %v769_v59 = vshrl.u32 %v4015_v57, %v757_v26 }
 0x196   :  { %v521_v10 = vsel %vm4773_vm10, %v4535_v23, %v518_v3  ;;  %v4828_v49 = vsub.s32 %v1317_v41, %v1320_v2  ;;  %v761_v4 = vor.u32 %v760_v40, %v759_v45  ;;  %v768_v7 = vshll.u32 %v4014_v55, %v756_v22 }
 0x197   :  { %3927 = vcosq.f32 %v521_v10  ;;  %v764_v38 = vor.u32 %v763_v36, %v762_v61  ;;  %v767_v15 = vor.u32 %v766_v5, %v765_v1  ;;  %v771_v12 = vshll.u32 %v4015_v57, %v756_v22 }
 0x198   :  { %3929 = vsinq.f32 %v521_v10  ;;  %v1323_v39 = vsub.s32 0, %v4828_v49  ;;  %v772_v24 = vshrl.u32 %v4016_v0, %v757_v26  ;;  %v4842_v37 = vand.u32 3, %v522_v18 }
 0x199   :  { %v4844_v54 = vand.u32 3, %v2208_v14  ;;  %vm1259_vm1 = vcmp.lt.s32.totalorder %v4642_v42, 0  ;;  %v770_v9 = vor.u32 %v769_v59, %v768_v7  ;;  %v750_v63 = vor.u32 8388608, %v749_v44 }
 0x19a   :  { %v3692_v11 = vmin.u32 %v1323_v39, %v4828_v49  ;;  %v773_v29 = vor.u32 %v772_v24, %v771_v12  ;;  %vm774_vm2 = vcmp.lt.s32.totalorder %v4830_v31, 1  ;;  %v1569_v32 = vand.u32 2139095040, %v4838_v16 }
 0x19b   :  { %v1343_v28 = vsub.s32 4, %v4815_v27  ;;  %v758_v17 = vshrl.u32 %v4011_v47, %v757_v26  ;;  %vm777_vm3 = vcmp.lt.s32.totalorder %v4830_v31, 4  ;;  %vm4855_vm4 = vcmp.le.f32.partialorder %v1257_v6, 0.7853982 }
 0x19c   :  { %v1325_v19 = vclz %v3692_v11  ;;  %vm775_vm5 = vcmp.lt.s32.totalorder %v4830_v31, 2  ;;  %vm776_vm6 = vcmp.lt.s32.totalorder %v4830_v31, 3  ;;  %v779_v43 = vsel %vm777_vm3, %v767_v15, 2102212464 }
 0x19d   :  { %v782_v41 = vsel %vm774_vm2, %v761_v4, %v764_v38  ;;  %vm531_vm7 = vcmp.eq.s32.totalorder %v4842_v37, 2  ;;  %v778_v8 = vsel %vm774_vm2, %v758_v17, %v761_v4  ;;  %v783_v52 = vsel %vm777_vm3, %v770_v9, 920167782 }
 0x19e   :  { %v3693_v48 = vadd.s32 4294967294, %v1325_v19  ;;  %v786_v22 = vsel %vm774_vm2, %v764_v38, %v767_v15  ;;  %vm528_vm8 = vcmp.eq.s32.totalorder %v4842_v37, 0  ;;  %vm2211_vm9 = vcmp.eq.s32.totalorder %v4844_v54, 0 }
 0x19f   :  { %v784_v6 = vsel %vm776_vm6, %v767_v15, %v783_v52  ;;  %v787_v60 = vsel %vm777_vm3, %v773_v29, 1326507024  ;;  %v790_v46 = vshll.u32 %v750_v63, 8  ;;  %v1570_v18 = vshrl.u32 %v1569_v32, 23 }
 0x1a0   :  { %vm527_vm10 = vcmp.lt.s32.totalorder %v4842_v37, 2  ;;  %vm2210_vm11 = vcmp.lt.s32.totalorder %v4844_v54, 2  ;;  %vm3694_vm12 = vcmp.lt.s32.totalorder %v3693_v48, 0  ;;  %v780_v35 = vsel %vm776_vm6, %v764_v38, %v779_v43 }
 0x1a1   :  { %v785_v33 = vsel %vm775_vm5, %v782_v41, %v784_v6  ;;  %v788_v50 = vsel %vm776_vm6, %v770_v9, %v787_v60  ;;  %vm525_vm13 = vweird.f32 %v4535_v23  ;;  %v1328_v56 = vsel %vm3694_vm12, 0, %v3693_v48 }
 0x1a2   :  { %v789_v26 = vsel %vm775_vm5, %v786_v22, %v788_v50  ;;  %v4877_v34 = vmul.u32.u64.low %v790_v46, %v785_v33  ;;  %v4878_v62 = vmul.u32.u64.high %v790_v46, %v785_v33, %v4877_v34  ;;  %vm2214_vm14 = vcmp.eq.s32.totalorder %v4844_v54, 2 }
 0x1a3   :  { %v1313_v30 = vadd.s32 %v4766_v58, %v4783_v25  ;;  %v1329_v14 = vsub.s32 32, %v1328_v56  ;;  %v1333_v2 = vsub.s32 4294967266, %v1328_v56  ;;  %v1344_v40 = vsel %vm1259_vm1, %v1343_v28, %v4815_v27 }
 0x1a4   :  { %v4887_v3 = vmul.u32.u64.low %v790_v46, %v789_v26  ;;  %v4888_v44 = vmul.u32.u64.high %v790_v46, %v789_v26, %v4887_v3  ;;  %v3703_v36 = vadd.s32 4294967169, %v1570_v18  ;;  %v3928_v5 = vpop.eup %3927  ;;  %v1330_v10 = vshll.u32 %v4828_v49, %v1328_v56 }
 0x1a5   :  { %v1331_v45 = vshrl.u32 %v1313_v30, %v1329_v14  ;;  %v1334_v61 = vadd.s32 127, %v1333_v2  ;;  %v781_v1 = vsel %vm775_vm5, %v778_v8, %v780_v35  ;;  %v3930_v59 = vpop.eup %3929  ;;  %v532_v58 = vxor.u32 2147483648, %v3928_v5 }
 0x1a6   :  { %v800_v25 = vadd.s32 1, %v4878_v62  ;;  %v1566_v39 = vand.u32 2147483647, %v4838_v16  ;;  %v1576_v4 = vadd.s32 1, %v3703_v36  ;;  %v529_v27 = vxor.u32 2147483648, %v3930_v59 }
 0x1a7   :  { %v1332_v7 = vor.u32 %v1331_v45, %v1330_v10  ;;  %v1335_v38 = vshll.u32 %v1334_v61, 23  ;;  %v1346_v15 = vsel %vm4855_vm4, 0, %v1344_v40  ;;  %v533_v49 = vsel %vm531_vm7, %v532_v58, %v3930_v59 }
 0x1a8   :  { %v2216_v31 = vsel %vm2214_vm14, %v532_v58, %v3930_v59  ;;  %v797_v12 = vmul.u32 %v790_v46, %v781_v1  ;;  %vm799_vm15 = vc.u32 %v4888_v44, %v4877_v34  ;;  %v530_v24 = vsel %vm528_vm8, %v3928_v5, %v529_v27  ;;  %v4942_v59 = vpop.f32.mrf.mxu0 }
 0x1a9   :  { %v2213_v11 = vsel %vm2211_vm9, %v3928_v5, %v529_v27  ;;  %v1336_v9 = vor.u32 4788187, %v1335_v38  ;;  %v1339_v63 = vcvt.s32.f32 %v1332_v7  ;;  %v534_v29 = vsel %vm527_vm10, %v530_v24, %v533_v49 }
 0x1aa   :  { %v2217_v32 = vsel %vm2210_vm11, %v2213_v11, %v2216_v31  ;;  %v801_v19 = vsel %vm799_vm15, %v800_v25, %v4878_v62  ;;  %vm1577_vm0 = vcmp.gt.s32.totalorder %v1576_v4, 0  ;;  %v535_v28 = vsel %vm525_vm13, nan, %v534_v29 }
 0x1ab   :  { %v2218_v17 = vsel %vm525_vm13, nan, %v2217_v32  ;;  %v1337_v43 = vand.u32 2147483647, %v1336_v9  ;;  %v802_v41 = vadd.s32 %v801_v19, %v797_v12  ;;  %v1877_v48 = vmul.f32 0.088388346, %v535_v28 }
 0x1ac   :  { %v3573_v8 = vmul.f32 0.088388346, %v2218_v17  ;;  %v1578_v52 = vsel %vm1577_vm0, %v1576_v4, 0  ;;  %v3040_v37 = vadd.s32 3, %v1346_v15  ;;  %v1573_v18 = vand.u32 8388607, %v1566_v39 }
 0x1ad   :  { %v1340_v22 = vmul.f32 %v1339_v63, %v1337_v43  ;;  %v803_v6 = vadd.s32 536870912, %v802_v41  ;;  %v1580_v60 = vand.u32 31, %v1578_v52  ;;  %1893 = vst [vmem:[#allocation2 + $0x10] sm:$0xff] %v1877_v48  ;;  %v4922_v33 = vand.u32 3, %v1346_v15 }
 0x1ae   :  { %3589 = vst [vmem:[#allocation4 + $0x10] sm:$0xff] %v3573_v8  ;;  %v4924_v50 = vand.u32 3, %v3040_v37  ;;  %v1574_v40 = vor.u32 8388608, %v1573_v18  ;;  %v1579_v45 = vshrl.u32 %v1578_v52, 5  ;;  %v798_v15 = vadd.s32 %v4877_v34, %v4888_v44 }
 0x1af   :  { %v1341_v54 = vxor.u32 2147483648, %v1340_v22  ;;  %v4916_v46 = vshrl.u32 %v803_v6, 30  ;;  %v1581_v35 = vsub.s32 32, %v1580_v60  ;;  %v1583_v36 = vshll.u32 %v4011_v47, %v1580_v60 }
 0x1b0   :  { %v1586_v5 = vshll.u32 %v4012_v51, %v1580_v60  ;;  %v1589_v20 = vshll.u32 %v4013_v53, %v1580_v60  ;;  %v1592_v61 = vshll.u32 %v4014_v55, %v1580_v60  ;;  %v1595_v1 = vshll.u32 %v4015_v57, %v1580_v60 }
 0x1b1   :  { %v1342_v23 = vsel %vm1259_vm1, %v1341_v54, %v1340_v22  ;;  %v805_v56 = vshll.u32 %v4916_v46, 30  ;;  %v1584_v62 = vshrl.u32 %v4012_v51, %v1581_v35  ;;  %v1587_v30 = vshrl.u32 %v4013_v53, %v1581_v35 }
 0x1b2   :  { %v1345_v26 = vsel %vm4855_vm4, %v4642_v42, %v1342_v23  ;;  %v1590_v14 = vshrl.u32 %v4014_v55, %v1581_v35  ;;  %v1593_v3 = vshrl.u32 %v4015_v57, %v1581_v35  ;;  %v1596_v27 = vshrl.u32 %v4016_v0, %v1581_v35 }
 0x1b3   :  { %3931 = vcosq.f32 %v1345_v26  ;;  %v4933_v2 = vsub.s32 %v802_v41, %v805_v56  ;;  %v1585_v58 = vor.u32 %v1584_v62, %v1583_v36  ;;  %v1588_v25 = vor.u32 %v1587_v30, %v1586_v5 }
 0x1b4   :  { %3933 = vsinq.f32 %v1345_v26  ;;  %v1591_v4 = vor.u32 %v1590_v14, %v1589_v20  ;;  %vm744_vm1 = vcmp.lt.s32.totalorder %v4751_v13, 0  ;;  %v1594_v38 = vor.u32 %v1593_v3, %v1592_v61 }
 0x1b5   :  { %v808_v10 = vsub.s32 0, %v4933_v2  ;;  %v1597_v49 = vor.u32 %v1596_v27, %v1595_v1  ;;  %v4949_v31 = vshll.u32 %v1574_v40, 8  ;;  %v642_v12 = vand.u32 2139095040, %v4942_v59 }
 0x1b6   :  { %vm4954_vm2 = vcmp.le.f32.partialorder %v742_v21, 0.7853982  ;;  %v828_v9 = vsub.s32 4, %v4916_v46  ;;  %vm1598_vm3 = vcmp.lt.s32.totalorder %v1579_v45, 1  ;;  %vm1601_vm4 = vcmp.lt.s32.totalorder %v1579_v45, 4 }
 0x1b7   :  { %v3672_v7 = vmin.u32 %v808_v10, %v4933_v2  ;;  %vm1355_vm5 = vcmp.eq.s32.totalorder %v4922_v33, 2  ;;  %vm3046_vm6 = vcmp.eq.s32.totalorder %v4924_v50, 2  ;;  %v1582_v34 = vshrl.u32 %v4011_v47, %v1581_v35 }
 0x1b8   :  { %vm1599_vm7 = vcmp.lt.s32.totalorder %v1579_v45, 2  ;;  %v1603_v44 = vsel %vm1601_vm4, %v1591_v4, 2102212464  ;;  %v1606_v63 = vsel %vm1598_vm3, %v1585_v58, %v1588_v25  ;;  %vm1352_vm8 = vcmp.eq.s32.totalorder %v4922_v33, 0 }
 0x1b9   :  { %v810_v11 = vclz %v3672_v7  ;;  %vm3043_vm9 = vcmp.eq.s32.totalorder %v4924_v50, 0  ;;  %vm1600_vm10 = vcmp.lt.s32.totalorder %v1579_v45, 3  ;;  %v1607_v29 = vsel %vm1601_vm4, %v1594_v38, 920167782 }
 0x1ba   :  { %v1610_v32 = vsel %vm1598_vm3, %v1588_v25, %v1591_v4  ;;  %vm1351_vm11 = vcmp.lt.s32.totalorder %v4922_v33, 2  ;;  %vm3042_vm12 = vcmp.lt.s32.totalorder %v4924_v50, 2  ;;  %v1602_v19 = vsel %vm1598_vm3, %v1582_v34, %v1585_v58 }
 0x1bb   :  { %v3673_v21 = vadd.s32 4294967294, %v810_v11  ;;  %v1608_v28 = vsel %vm1600_vm10, %v1591_v4, %v1607_v29  ;;  %v1611_v17 = vsel %vm1601_vm4, %v1597_v49, 1326507024  ;;  %v643_v43 = vshrl.u32 %v642_v12, 23 }
 0x1bc   :  { %vm1349_vm13 = vweird.f32 %v4642_v42  ;;  %v1604_v41 = vsel %vm1600_vm10, %v1588_v25, %v1603_v44  ;;  %v1609_v48 = vsel %vm1599_vm7, %v1606_v63, %v1608_v28  ;;  %v1612_v8 = vsel %vm1600_vm10, %v1594_v38, %v1611_v17 }
 0x1bd   :  { %vm3674_vm14 = vcmp.lt.s32.totalorder %v3673_v21, 0  ;;  %v1613_v22 = vsel %vm1599_vm7, %v1610_v32, %v1612_v8  ;;  %v4976_v37 = vmul.u32.u64.low %v4949_v31, %v1609_v48  ;;  %v4977_v6 = vmul.u32.u64.high %v4949_v31, %v1609_v48, %v4976_v37 }
 0x1be   :  { %v813_v52 = vsel %vm3674_vm14, 0, %v3673_v21  ;;  %v829_v18 = vsel %vm744_vm1, %v828_v9, %v4916_v46  ;;  %v3667_v35 = vadd.s32 4294967169, %v643_v43  ;;  %v1605_v56 = vsel %vm1599_vm7, %v1602_v19, %v1604_v41  ;;  %v5015_v21 = vpop.f32.mrf.mxu1 }
 0x1bf   :  { %v814_v60 = vsub.s32 32, %v813_v52  ;;  %v818_v54 = vsub.s32 4294967266, %v813_v52  ;;  %v4985_v26 = vmul.u32.u64.low %v4949_v31, %v1613_v22  ;;  %v4986_v62 = vmul.u32.u64.high %v4949_v31, %v1613_v22, %v4985_v26 }
 0x1c0   :  { %v3932_v23 = vpop.eup %3931  ;;  %v639_v30 = vand.u32 2147483647, %v4942_v59  ;;  %v815_v3 = vshll.u32 %v4933_v2, %v813_v52  ;;  %v831_v46 = vsel %vm4954_vm2, 0, %v829_v18  ;;  %v1624_v10 = vadd.s32 1, %v4977_v6 }
 0x1c1   :  { %v3934_v14 = vpop.eup %3933  ;;  %v1356_v40 = vxor.u32 2147483648, %v3932_v23  ;;  %v816_v36 = vshrl.u32 %v798_v15, %v814_v60  ;;  %v819_v5 = vadd.s32 127, %v818_v54  ;;  %v649_v45 = vadd.s32 1, %v3667_v35 }
 0x1c2   :  { %v1353_v20 = vxor.u32 2147483648, %v3934_v14  ;;  %v1621_v27 = vmul.u32 %v4949_v31, %v1605_v56  ;;  %vm1623_vm15 = vc.u32 %v4986_v62, %v4976_v37  ;;  %v646_v33 = vand.u32 8388607, %v639_v30 }
 0x1c3   :  { %v1357_v61 = vsel %vm1355_vm5, %v1356_v40, %v3934_v14  ;;  %v3048_v1 = vsel %vm3046_vm6, %v1356_v40, %v3934_v14  ;;  %v817_v58 = vor.u32 %v816_v36, %v815_v3  ;;  %v820_v25 = vshll.u32 %v819_v5, 23 }
 0x1c4   :  { %v1354_v2 = vsel %vm1352_vm8, %v3932_v23, %v1353_v20  ;;  %v3045_v4 = vsel %vm3043_vm9, %v3932_v23, %v1353_v20  ;;  %v1625_v9 = vsel %vm1623_vm15, %v1624_v10, %v4977_v6  ;;  %vm650_vm0 = vcmp.gt.s32.totalorder %v649_v45, 0 }
 0x1c5   :  { %v1358_v7 = vsel %vm1351_vm11, %v1354_v2, %v1357_v61  ;;  %v3049_v38 = vsel %vm3042_vm12, %v3045_v4, %v3048_v1  ;;  %v821_v15 = vor.u32 4788187, %v820_v25  ;;  %v824_v49 = vcvt.s32.f32 %v817_v58 }
 0x1c6   :  { %v1359_v12 = vsel %vm1349_vm13, nan, %v1358_v7  ;;  %v3050_v11 = vsel %vm1349_vm13, nan, %v3049_v38  ;;  %v1626_v63 = vadd.s32 %v1625_v9, %v1621_v27  ;;  %v651_v50 = vsel %vm650_vm0, %v649_v45, 0 }
 0x1c7   :  { %v1885_v31 = vmul.f32 0.088388346, %v1359_v12  ;;  %v3581_v34 = vmul.f32 0.088388346, %v3050_v11  ;;  %v822_v44 = vand.u32 2147483647, %v821_v15  ;;  %vm834_vm12 = vweird.f32 %v4751_v13 }
 0x1c8   :  { %v2520_v32 = vadd.s32 3, %v831_v46  ;;  %v1627_v19 = vadd.s32 536870912, %v1626_v63  ;;  %v653_v42 = vand.u32 31, %v651_v50  ;;  %v1466_v41 = vand.u32 2139095040, %v5015_v21 }
 0x1c9   :  { %1901 = vst [vmem:[#allocation2 + $0x50] sm:$0xff] %v1885_v31  ;;  %3597 = vst [vmem:[#allocation4 + $0x50] sm:$0xff] %v3581_v34  ;;  %v825_v29 = vmul.f32 %v824_v49, %v822_v44  ;;  %v5020_v48 = vand.u32 3, %v831_v46  ;;  %v647_v6 = vor.u32 8388608, %v646_v33  ;;  %v652_v36 = vshrl.u32 %v651_v50, 5 }
 0x1ca   :  { %v5017_v17 = vshrl.u32 %v1627_v19, 30  ;;  %v654_v43 = vsub.s32 32, %v653_v42  ;;  %v5024_v52 = vand.u32 3, %v2520_v32  ;;  %v1467_v26 = vshrl.u32 %v1466_v41, 23 }
 0x1cb   :  { %v826_v28 = vxor.u32 2147483648, %v825_v29  ;;  %v656_v14 = vshll.u32 %v4011_v47, %v653_v42  ;;  %v659_v40 = vshll.u32 %v4012_v51, %v653_v42  ;;  %v662_v24 = vshll.u32 %v4013_v53, %v653_v42 }
 0x1cc   :  { %v1629_v22 = vshll.u32 %v5017_v17, 30  ;;  %v657_v54 = vshrl.u32 %v4012_v51, %v654_v43  ;;  %v660_v18 = vshrl.u32 %v4013_v53, %v654_v43  ;;  %v663_v35 = vshrl.u32 %v4014_v55, %v654_v43 }
 0x1cd   :  { %v827_v8 = vsel %vm744_vm1, %v826_v28, %v825_v29  ;;  %v666_v56 = vshrl.u32 %v4015_v57, %v654_v43  ;;  %v665_v5 = vshll.u32 %v4014_v55, %v653_v42  ;;  %v668_v20 = vshll.u32 %v4015_v57, %v653_v42 }
 0x1ce   :  { %v830_v60 = vsel %vm4954_vm2, %v4751_v13, %v827_v8  ;;  %v5033_v23 = vsub.s32 %v1626_v63, %v1629_v22  ;;  %v658_v46 = vor.u32 %v657_v54, %v656_v14  ;;  %v661_v10 = vor.u32 %v660_v18, %v659_v40 }
 0x1cf   :  { %3935 = vcosq.f32 %v830_v60  ;;  %v664_v45 = vor.u32 %v663_v35, %v662_v24  ;;  %v669_v61 = vshrl.u32 %v4016_v0, %v654_v43  ;;  %v667_v58 = vor.u32 %v666_v56, %v665_v5 }
 0x1d0   :  { %3937 = vsinq.f32 %v830_v60  ;;  %v1632_v3 = vsub.s32 0, %v5033_v23  ;;  %v5044_v2 = vshll.u32 %v647_v6, 8  ;;  %v1463_v4 = vand.u32 2147483647, %v5015_v21 }
 0x1d1   :  { %v670_v25 = vor.u32 %v669_v61, %v668_v20  ;;  %v3699_v27 = vadd.s32 4294967169, %v1467_v26  ;;  %vm1568_vm1 = vcmp.lt.s32.totalorder %v4838_v16, 0  ;;  %v1652_v38 = vsub.s32 4, %v5017_v17 }
 0x1d2   :  { %v3704_v1 = vmin.u32 %v1632_v3, %v5033_v23  ;;  %vm671_vm2 = vcmp.lt.s32.totalorder %v652_v36, 1  ;;  %vm674_vm3 = vcmp.lt.s32.totalorder %v652_v36, 4  ;;  %vm840_vm4 = vcmp.eq.s32.totalorder %v5020_v48, 2 }
 0x1d3   :  { %vm2526_vm5 = vcmp.eq.s32.totalorder %v5024_v52, 2  ;;  %v655_v15 = vshrl.u32 %v4011_v47, %v654_v43  ;;  %vm672_vm6 = vcmp.lt.s32.totalorder %v652_v36, 2  ;;  %v676_v49 = vsel %vm674_vm3, %v664_v45, 2102212464 }
 0x1d4   :  { %v1634_v7 = vclz %v3704_v1  ;;  %v679_v12 = vsel %vm671_vm2, %v658_v46, %v661_v10  ;;  %vm837_vm7 = vcmp.eq.s32.totalorder %v5020_v48, 0  ;;  %vm2523_vm8 = vcmp.eq.s32.totalorder %v5024_v52, 0 }
 0x1d5   :  { %vm673_vm9 = vcmp.lt.s32.totalorder %v652_v36, 3  ;;  %v680_v9 = vsel %vm674_vm3, %v667_v58, 920167782  ;;  %v683_v31 = vsel %vm671_vm2, %v661_v10, %v664_v45  ;;  %vm836_vm10 = vcmp.lt.s32.totalorder %v5020_v48, 2 }
 0x1d6   :  { %v3705_v11 = vadd.s32 4294967294, %v1634_v7  ;;  %vm2522_vm11 = vcmp.lt.s32.totalorder %v5024_v52, 2  ;;  %v675_v34 = vsel %vm671_vm2, %v655_v15, %v658_v46  ;;  %v681_v44 = vsel %vm673_vm9, %v664_v45, %v680_v9 }
 0x1d7   :  { %v684_v63 = vsel %vm674_vm3, %v670_v25, 1326507024  ;;  %v1473_v33 = vadd.s32 1, %v3699_v27  ;;  %v677_v50 = vsel %vm673_vm9, %v661_v10, %v676_v49  ;;  %v682_v29 = vsel %vm672_vm6, %v679_v12, %v681_v44 }
 0x1d8   :  { %vm3706_vm13 = vcmp.lt.s32.totalorder %v3705_v11, 0  ;;  %v685_v32 = vsel %vm673_vm9, %v667_v58, %v684_v63  ;;  %v5066_v28 = vmul.u32.u64.low %v5044_v2, %v682_v29  ;;  %v5067_v43 = vmul.u32.u64.high %v5044_v2, %v682_v29, %v5066_v28 }
 0x1d9   :  { %v1637_v19 = vsel %vm3706_vm13, 0, %v3705_v11  ;;  %v686_v42 = vsel %vm672_vm6, %v683_v31, %v685_v32  ;;  %v1622_v41 = vadd.s32 %v4976_v37, %v4986_v62  ;;  %vm1474_vm14 = vcmp.gt.s32.totalorder %v1473_v33, 0 }
 0x1da   :  { %v1638_v8 = vsub.s32 32, %v1637_v19  ;;  %v1642_v22 = vsub.s32 4294967266, %v1637_v19  ;;  %v678_v60 = vsel %vm672_vm6, %v675_v34, %v677_v50  ;;  %v1475_v35 = vsel %vm1474_vm14, %v1473_v33, 0 }
 0x1db   :  { %v5074_v54 = vmul.u32.u64.low %v5044_v2, %v686_v42  ;;  %v5075_v18 = vmul.u32.u64.high %v5044_v2, %v686_v42, %v5074_v54  ;;  %v1639_v14 = vshll.u32 %v5033_v23, %v1637_v19  ;;  %v1653_v37 = vsel %vm1568_vm1, %v1652_v38, %v5017_v17 }
 0x1dc   :  { %v3936_v6 = vpop.eup %3935  ;;  %v1640_v40 = vshrl.u32 %v1622_v41, %v1638_v8  ;;  %v1643_v24 = vadd.s32 127, %v1642_v22  ;;  %v697_v62 = vadd.s32 1, %v5067_v43  ;;  %v1477_v36 = vand.u32 31, %v1475_v35 }
 0x1dd   :  { %v3938_v56 = vpop.eup %3937  ;;  %v841_v26 = vxor.u32 2147483648, %v3936_v6  ;;  %v694_v61 = vmul.u32 %v5044_v2, %v678_v60  ;;  %vm696_vm15 = vc.u32 %v5075_v18, %v5066_v28  ;;  %vm5104_vm0 = vcmp.le.f32.partialorder %v1566_v39, 0.7853982 }
 0x1de   :  { %v838_v3 = vxor.u32 2147483648, %v3938_v56  ;;  %v1641_v46 = vor.u32 %v1640_v40, %v1639_v14  ;;  %v1644_v10 = vshll.u32 %v1643_v24, 23  ;;  %v698_v38 = vsel %vm696_vm15, %v697_v62, %v5067_v43  ;;  %v5132_v40 = vpop.f32.mrf.mxu0 }
 0x1df   :  { %v842_v5 = vsel %vm840_vm4, %v841_v26, %v3938_v56  ;;  %v2528_v20 = vsel %vm2526_vm5, %v841_v26, %v3938_v56  ;;  %v1478_v2 = vsub.s32 32, %v1477_v36  ;;  %v699_v11 = vadd.s32 %v698_v38, %v694_v61 }
 0x1e0   :  { %v839_v23 = vsel %vm837_vm7, %v3936_v6, %v838_v3  ;;  %v2525_v45 = vsel %vm2523_vm8, %v3936_v6, %v838_v3  ;;  %v1645_v58 = vor.u32 4788187, %v1644_v10  ;;  %v1648_v25 = vcvt.s32.f32 %v1641_v46 }
 0x1e1   :  { %v843_v17 = vsel %vm836_vm10, %v839_v23, %v842_v5  ;;  %v2529_v1 = vsel %vm2522_vm11, %v2525_v45, %v2528_v20  ;;  %v1470_v52 = vand.u32 8388607, %v1463_v4  ;;  %v700_v9 = vadd.s32 536870912, %v699_v11 }
 0x1e2   :  { %v844_v27 = vsel %vm834_vm12, nan, %v843_v17  ;;  %v2530_v7 = vsel %vm834_vm12, nan, %v2529_v1  ;;  %v1646_v12 = vand.u32 2147483647, %v1645_v58  ;;  %v1481_v31 = vshrl.u32 %v4012_v51, %v1478_v2 }
 0x1e3   :  { %v1880_v15 = vmul.f32 0.088388346, %v844_v27  ;;  %v3576_v49 = vmul.f32 0.088388346, %v2530_v7  ;;  %v1484_v34 = vshrl.u32 %v4013_v53, %v1478_v2  ;;  %v1655_v44 = vsel %vm5104_vm0, 0, %v1653_v37 }
 0x1e4   :  { %v1649_v13 = vmul.f32 %v1648_v25, %v1646_v12  ;;  %v5114_v63 = vshrl.u32 %v1475_v35, 5  ;;  %v1487_v39 = vshrl.u32 %v4014_v55, %v1478_v2  ;;  %v1490_v33 = vshrl.u32 %v4015_v57, %v1478_v2 }
 0x1e5   :  { %1896 = vst [vmem:[#allocation2 + $0x28] sm:$0xff] %v1880_v15  ;;  %3592 = vst [vmem:[#allocation4 + $0x28] sm:$0xff] %v3576_v49  ;;  %v5118_v29 = vshrl.u32 %v700_v9, 30  ;;  %v1480_v32 = vshll.u32 %v4011_v47, %v1477_v36  ;;  %v1483_v19 = vshll.u32 %v4012_v51, %v1477_v36  ;;  %v1486_v42 = vshll.u32 %v4013_v53, %v1477_v36 }
 0x1e6   :  { %v1650_v50 = vxor.u32 2147483648, %v1649_v13  ;;  %v1489_v43 = vshll.u32 %v4014_v55, %v1477_v36  ;;  %v1492_v41 = vshll.u32 %v4015_v57, %v1477_v36  ;;  %v1493_v8 = vshrl.u32 %v4016_v0, %v1478_v2 }
 0x1e7   :  { %v702_v6 = vshll.u32 %v5118_v29, 30  ;;  %v1482_v60 = vor.u32 %v1481_v31, %v1480_v32  ;;  %v1485_v54 = vor.u32 %v1484_v34, %v1483_v19  ;;  %v1488_v56 = vor.u32 %v1487_v39, %v1486_v42 }
 0x1e8   :  { %v1651_v22 = vsel %vm1568_vm1, %v1650_v50, %v1649_v13  ;;  %v1491_v26 = vor.u32 %v1490_v33, %v1489_v43  ;;  %v1494_v14 = vor.u32 %v1493_v8, %v1492_v41  ;;  %v3352_v24 = vadd.s32 3, %v1655_v44 }
 0x1e9   :  { %v1654_v35 = vsel %vm5104_vm0, %v4838_v16, %v1651_v22  ;;  %v5134_v3 = vsub.s32 %v699_v11, %v702_v6  ;;  %v1471_v37 = vor.u32 8388608, %v1470_v52  ;;  %v5136_v62 = vand.u32 3, %v1655_v44 }
 0x1ea   :  { %3939 = vcosq.f32 %v1654_v35  ;;  %vm1495_vm1 = vcmp.lt.s32.totalorder %v5114_v63, 1  ;;  %vm1498_vm2 = vcmp.lt.s32.totalorder %v5114_v63, 4  ;;  %v951_v5 = vand.u32 2139095040, %v5132_v40 }
 0x1eb   :  { %3941 = vsinq.f32 %v1654_v35  ;;  %v705_v36 = vsub.s32 0, %v5134_v3  ;;  %v1503_v20 = vsel %vm1495_vm1, %v1482_v60, %v1485_v54  ;;  %v1504_v46 = vsel %vm1498_vm2, %v1491_v26, 920167782 }
 0x1ec   :  { %v1507_v10 = vsel %vm1495_vm1, %v1485_v54, %v1488_v56  ;;  %v1508_v23 = vsel %vm1498_vm2, %v1494_v14, 1326507024  ;;  %v5146_v45 = vand.u32 3, %v3352_v24  ;;  %vm1497_vm3 = vcmp.lt.s32.totalorder %v5114_v63, 3 }
 0x1ed   :  { %v3668_v61 = vmin.u32 %v705_v36, %v5134_v3  ;;  %v1511_v17 = vshll.u32 %v1471_v37, 8  ;;  %vm1496_vm4 = vcmp.lt.s32.totalorder %v5114_v63, 2  ;;  %v1500_v1 = vsel %vm1498_vm2, %v1488_v56, 2102212464 }
 0x1ee   :  { %v1505_v58 = vsel %vm1497_vm3, %v1488_v56, %v1504_v46  ;;  %v1509_v25 = vsel %vm1497_vm3, %v1491_v26, %v1508_v23  ;;  %v952_v15 = vshrl.u32 %v951_v5, 23  ;;  %v1479_v49 = vshrl.u32 %v4011_v47, %v1478_v2 }
 0x1ef   :  { %v707_v27 = vclz %v3668_v61  ;;  %v1506_v7 = vsel %vm1496_vm4, %v1503_v20, %v1505_v58  ;;  %v1510_v38 = vsel %vm1496_vm4, %v1507_v10, %v1509_v25  ;;  %v948_v12 = vand.u32 2147483647, %v5132_v40 }
 0x1f0   :  { %vm1661_vm5 = vcmp.eq.s32.totalorder %v5136_v62, 0  ;;  %vm641_vm6 = vcmp.lt.s32.totalorder %v4942_v59, 0  ;;  %v5163_v48 = vmul.u32.u64.low %v1511_v17, %v1510_v38  ;;  %v5164_v52 = vmul.u32.u64.high %v1511_v17, %v1510_v38, %v5163_v48 }
 0x1f1   :  { %v3669_v11 = vadd.s32 4294967294, %v707_v27  ;;  %v3679_v13 = vadd.s32 4294967169, %v952_v15  ;;  %vm1660_vm7 = vcmp.lt.s32.totalorder %v5136_v62, 2  ;;  %v1499_v9 = vsel %vm1495_vm1, %v1479_v49, %v1482_v60 }
 0x1f2   :  { %v1501_v31 = vsel %vm1497_vm3, %v1485_v54, %v1500_v1  ;;  %v5171_v2 = vmul.u32.u64.low %v1511_v17, %v1506_v7  ;;  %v5172_v34 = vmul.u32.u64.high %v1511_v17, %v1506_v7, %v5171_v2  ;;  %vm1658_vm8 = vweird.f32 %v4838_v16 }
 0x1f3   :  { %vm1664_vm9 = vcmp.eq.s32.totalorder %v5136_v62, 2  ;;  %vm3354_vm10 = vcmp.lt.s32.totalorder %v5146_v45, 2  ;;  %vm3670_vm11 = vcmp.lt.s32.totalorder %v3669_v11, 0  ;;  %v958_v44 = vadd.s32 1, %v3679_v13 }
 0x1f4   :  { %vm3355_vm12 = vcmp.eq.s32.totalorder %v5146_v45, 0  ;;  %vm3358_vm13 = vcmp.eq.s32.totalorder %v5146_v45, 2  ;;  %v695_v39 = vadd.s32 %v5066_v28, %v5075_v18  ;;  %v710_v33 = vsel %vm3670_vm11, 0, %v3669_v11 }
 0x1f5   :  { %v711_v50 = vsub.s32 32, %v710_v33  ;;  %v715_v32 = vsub.s32 4294967266, %v710_v33  ;;  %v725_v19 = vsub.s32 4, %v5118_v29  ;;  %v1502_v42 = vsel %vm1496_vm4, %v1499_v9, %v1501_v31 }
 0x1f6   :  { %v712_v41 = vshll.u32 %v5134_v3, %v710_v33  ;;  %vm1520_vm14 = vc.u32 %v5164_v52, %v5171_v2  ;;  %v1521_v8 = vadd.s32 1, %v5172_v34  ;;  %vm959_vm15 = vcmp.gt.s32.totalorder %v958_v44, 0 }
 0x1f7   :  { %v3940_v43 = vpop.eup %3939  ;;  %v713_v28 = vshrl.u32 %v695_v39, %v711_v50  ;;  %v716_v18 = vadd.s32 127, %v715_v32  ;;  %v960_v60 = vsel %vm959_vm15, %v958_v44, 0  ;;  %v1518_v35 = vmul.u32 %v1511_v17, %v1502_v42 }
 0x1f8   :  { %v3942_v22 = vpop.eup %3941  ;;  %v1665_v6 = vxor.u32 2147483648, %v3940_v43  ;;  %v1522_v56 = vsel %vm1520_vm14, %v1521_v8, %v5172_v34  ;;  %v962_v63 = vand.u32 31, %v960_v60  ;;  %v726_v5 = vsel %vm641_vm6, %v725_v19, %v5118_v29 }
 0x1f9   :  { %v1662_v54 = vxor.u32 2147483648, %v3942_v22  ;;  %v714_v24 = vor.u32 %v713_v28, %v712_v41  ;;  %v717_v3 = vshll.u32 %v716_v18, 23  ;;  %v1523_v20 = vadd.s32 %v1522_v56, %v1518_v35 }
 0x1fa   :  { %v1666_v26 = vsel %vm1664_vm9, %v1665_v6, %v3942_v22  ;;  %v3360_v14 = vsel %vm3358_vm13, %v1665_v6, %v3942_v22  ;;  %v963_v61 = vsub.s32 32, %v962_v63  ;;  %v955_v25 = vand.u32 8388607, %v948_v12 }
 0x1fb   :  { %v1663_v37 = vsel %vm1661_vm5, %v3940_v43, %v1662_v54  ;;  %v3357_v36 = vsel %vm3355_vm12, %v3940_v43, %v1662_v54  ;;  %v718_v23 = vor.u32 4788187, %v717_v3  ;;  %v1524_v58 = vadd.s32 536870912, %v1523_v20 }
 0x1fc   :  { %v1667_v46 = vsel %vm1660_vm7, %v1663_v37, %v1666_v26  ;;  %v3361_v10 = vsel %vm3354_vm10, %v3357_v36, %v3360_v14  ;;  %v721_v62 = vcvt.s32.f32 %v714_v24  ;;  %vm5213_vm0 = vcmp.le.f32.partialorder %v639_v30, 0.7853982 }
 0x1fd   :  { %v1668_v17 = vsel %vm1658_vm8, nan, %v1667_v46  ;;  %v3362_v1 = vsel %vm1658_vm8, nan, %v3361_v10  ;;  %v719_v7 = vand.u32 2147483647, %v718_v23  ;;  %v5217_v38 = vshrl.u32 %v1524_v58, 30 }
 0x1fe   :  { %v1888_v29 = vmul.f32 0.088388346, %v1668_v17  ;;  %v3584_v27 = vmul.f32 0.088388346, %v3362_v1  ;;  %v966_v15 = vshrl.u32 %v4012_v51, %v963_v61  ;;  %v969_v49 = vshrl.u32 %v4013_v53, %v963_v61 }
 0x1ff   :  { %v722_v16 = vmul.f32 %v721_v62, %v719_v7  ;;  %v972_v11 = vshrl.u32 %v4014_v55, %v963_v61  ;;  %v728_v48 = vsel %vm5213_vm0, 0, %v726_v5  ;;  %v1526_v13 = vshll.u32 %v5217_v38, 30 }
 0x200   :  { %1904 = vst [vmem:[#allocation2 + $0x68] sm:$0xff] %v1888_v29  ;;  %3600 = vst [vmem:[#allocation4 + $0x68] sm:$0xff] %v3584_v27  ;;  %v956_v30 = vor.u32 8388608, %v955_v25  ;;  %v965_v9 = vshll.u32 %v4011_v47, %v962_v63  ;;  %v968_v34 = vshll.u32 %v4012_v51, %v962_v63  ;;  %v971_v44 = vshll.u32 %v4013_v53, %v962_v63 }
 0x201   :  { %v723_v31 = vxor.u32 2147483648, %v722_v16  ;;  %v975_v39 = vshrl.u32 %v4015_v57, %v963_v61  ;;  %v5229_v33 = vsub.s32 %v1523_v20, %v1526_v13  ;;  %v961_v50 = vshrl.u32 %v960_v60, 5  ;;  %v5240_v60 = vpop.f32.mrf.mxu1 }
 0x202   :  { %v974_v32 = vshll.u32 %v4014_v55, %v962_v63  ;;  %v978_v19 = vshrl.u32 %v4016_v0, %v963_v61  ;;  %v967_v43 = vor.u32 %v966_v15, %v965_v9  ;;  %v970_v41 = vor.u32 %v969_v49, %v968_v34 }
 0x203   :  { %v724_v42 = vsel %vm641_vm6, %v723_v31, %v722_v16  ;;  %v973_v8 = vor.u32 %v972_v11, %v971_v44  ;;  %v1529_v6 = vsub.s32 0, %v5229_v33  ;;  %v977_v18 = vshll.u32 %v4015_v57, %v962_v63 }
 0x204   :  { %v727_v22 = vsel %vm5213_vm0, %v4942_v59, %v724_v42  ;;  %v976_v28 = vor.u32 %v975_v39, %v974_v32  ;;  %v5242_v54 = vand.u32 3, %v728_v48  ;;  %v2416_v35 = vadd.s32 3, %v728_v48 }
 0x205   :  { %3943 = vcosq.f32 %v727_v22  ;;  %v3700_v56 = vmin.u32 %v1529_v6, %v5229_v33  ;;  %v979_v26 = vor.u32 %v978_v19, %v977_v18  ;;  %v996_v14 = vshll.u32 %v956_v30, 8 }
 0x206   :  { %3945 = vsinq.f32 %v727_v22  ;;  %v964_v24 = vshrl.u32 %v4011_v47, %v963_v61  ;;  %vm980_vm1 = vcmp.lt.s32.totalorder %v961_v50, 1  ;;  %vm983_vm2 = vcmp.lt.s32.totalorder %v961_v50, 4 }
 0x207   :  { %v1775_v3 = vand.u32 2139095040, %v5240_v60  ;;  %vm1465_vm3 = vcmp.lt.s32.totalorder %v5015_v21, 0  ;;  %v1531_v63 = vclz %v3700_v56  ;;  %v985_v37 = vsel %vm983_vm2, %v973_v8, 2102212464 }
 0x208   :  { %v988_v36 = vsel %vm980_vm1, %v967_v43, %v970_v41  ;;  %v989_v5 = vsel %vm983_vm2, %v976_v28, 920167782  ;;  %v1549_v20 = vsub.s32 4, %v5217_v38  ;;  %vm981_vm4 = vcmp.lt.s32.totalorder %v961_v50, 2 }
 0x209   :  { %vm982_vm5 = vcmp.lt.s32.totalorder %v961_v50, 3  ;;  %v984_v46 = vsel %vm980_vm1, %v964_v24, %v967_v43  ;;  %v3701_v10 = vadd.s32 4294967294, %v1531_v63  ;;  %v992_v17 = vsel %vm980_vm1, %v970_v41, %v973_v8 }
 0x20a   :  { %v990_v23 = vsel %vm982_vm5, %v973_v8, %v989_v5  ;;  %v993_v1 = vsel %vm983_vm2, %v979_v26, 1326507024  ;;  %v986_v61 = vsel %vm982_vm5, %v970_v41, %v985_v37  ;;  %v1776_v29 = vshrl.u32 %v1775_v3, 23 }
 0x20b   :  { %v991_v58 = vsel %vm981_vm4, %v988_v36, %v990_v23  ;;  %v994_v25 = vsel %vm982_vm5, %v976_v28, %v993_v1  ;;  %vm5252_vm6 = vcmp.le.f32.partialorder %v1463_v4, 0.7853982  ;;  %vm3702_vm7 = vcmp.lt.s32.totalorder %v3701_v10, 0 }
 0x20c   :  { %v995_v7 = vsel %vm981_vm4, %v992_v17, %v994_v25  ;;  %v5257_v62 = vmul.u32.u64.low %v996_v14, %v991_v58  ;;  %v5258_v45 = vmul.u32.u64.high %v996_v14, %v991_v58, %v5257_v62  ;;  %v1534_v16 = vsel %vm3702_vm7, 0, %v3701_v10 }
 0x20d   :  { %v5261_v15 = vmul.u32.u64.low %v996_v14, %v995_v7  ;;  %v5262_v49 = vmul.u32.u64.high %v996_v14, %v995_v7, %v5261_v15  ;;  %v3711_v11 = vadd.s32 4294967169, %v1776_v29  ;;  %vm733_vm8 = vcmp.lt.s32.totalorder %v5242_v54, 2 }
 0x20e   :  { %v1519_v4 = vadd.s32 %v5171_v2, %v5164_v52  ;;  %v1535_v48 = vsub.s32 32, %v1534_v16  ;;  %v1539_v13 = vsub.s32 4294967266, %v1534_v16  ;;  %v987_v30 = vsel %vm981_vm4, %v984_v46, %v986_v61 }
 0x20f   :  { %vm731_vm9 = vweird.f32 %v4942_v59  ;;  %vm734_vm10 = vcmp.eq.s32.totalorder %v5242_v54, 0  ;;  %vm737_vm11 = vcmp.eq.s32.totalorder %v5242_v54, 2  ;;  %v2417_v9 = vand.u32 3, %v2416_v35 }
 0x210   :  { %v1782_v31 = vadd.s32 1, %v3711_v11  ;;  %v1536_v34 = vshll.u32 %v5229_v33, %v1534_v16  ;;  %v1537_v44 = vshrl.u32 %v1519_v4, %v1535_v48  ;;  %v1540_v39 = vadd.s32 127, %v1539_v13 }
 0x211   :  { %v1006_v32 = vadd.s32 1, %v5258_v45  ;;  %v1550_v52 = vsel %vm1465_vm3, %v1549_v20, %v5217_v38  ;;  %v1003_v2 = vmul.u32 %v996_v14, %v987_v30  ;;  %vm1005_vm12 = vc.u32 %v5262_v49, %v5257_v62 }
 0x212   :  { %vm1783_vm13 = vcmp.gt.s32.totalorder %v1782_v31, 0  ;;  %v3944_v50 = vpop.eup %3943  ;;  %v1538_v19 = vor.u32 %v1537_v44, %v1536_v34  ;;  %v1541_v42 = vshll.u32 %v1540_v39, 23  ;;  %vm2418_vm14 = vcmp.lt.s32.totalorder %v2417_v9, 2  ;;  %v5318_v39 = vpop.f32.mrf.mxu0 }
 0x213   :  { %v1007_v43 = vsel %vm1005_vm12, %v1006_v32, %v5258_v45  ;;  %v1784_v41 = vsel %vm1783_vm13, %v1782_v31, 0  ;;  %v3946_v33 = vpop.eup %3945  ;;  %v738_v8 = vxor.u32 2147483648, %v3944_v50  ;;  %vm2419_vm15 = vcmp.eq.s32.totalorder %v2417_v9, 0 }
 0x214   :  { %v1008_v22 = vadd.s32 %v1007_v43, %v1003_v2  ;;  %v1786_v6 = vand.u32 31, %v1784_v41  ;;  %v735_v28 = vxor.u32 2147483648, %v3946_v33  ;;  %vm2422_vm0 = vcmp.eq.s32.totalorder %v2417_v9, 2 }
 0x215   :  { %v1542_v38 = vor.u32 4788187, %v1541_v42  ;;  %v739_v18 = vsel %vm737_vm11, %v738_v8, %v3946_v33  ;;  %v2424_v35 = vsel %vm2422_vm0, %v738_v8, %v3946_v33  ;;  %v1552_v56 = vsel %vm5252_vm6, 0, %v1550_v52 }
 0x216   :  { %v1009_v26 = vadd.s32 536870912, %v1008_v22  ;;  %v736_v14 = vsel %vm734_vm10, %v3944_v50, %v735_v28  ;;  %v2421_v24 = vsel %vm2419_vm15, %v3944_v50, %v735_v28  ;;  %v1545_v63 = vcvt.s32.f32 %v1538_v19 }
 0x217   :  { %v1543_v3 = vand.u32 2147483647, %v1542_v38  ;;  %v740_v37 = vsel %vm733_vm8, %v736_v14, %v739_v18  ;;  %v2425_v36 = vsel %vm2418_vm14, %v2421_v24, %v2424_v35  ;;  %v1787_v20 = vsub.s32 32, %v1786_v6 }
 0x218   :  { %v5288_v5 = vshrl.u32 %v1009_v26, 30  ;;  %v741_v46 = vsel %vm731_vm9, nan, %v740_v37  ;;  %v2426_v10 = vsel %vm731_vm9, nan, %v2425_v36  ;;  %v1772_v17 = vand.u32 2147483647, %v5240_v60 }
 0x219   :  { %v1546_v23 = vmul.f32 %v1545_v63, %v1543_v3  ;;  %v1879_v1 = vmul.f32 0.088388346, %v741_v46  ;;  %v3575_v61 = vmul.f32 0.088388346, %v2426_v10  ;;  %v5296_v25 = vand.u32 3, %v1552_v56 }
 0x21a   :  { %v1011_v58 = vshll.u32 %v5288_v5, 30  ;;  %v3248_v29 = vadd.s32 3, %v1552_v56  ;;  %v1790_v45 = vshrl.u32 %v4012_v51, %v1787_v20  ;;  %v1793_v59 = vshrl.u32 %v4013_v53, %v1787_v20 }
 0x21b   :  { %v1547_v54 = vxor.u32 2147483648, %v1546_v23  ;;  %1895 = vst [vmem:[#allocation2 + $0x20] sm:$0xff] %v1879_v1  ;;  %3591 = vst [vmem:[#allocation4 + $0x20] sm:$0xff] %v3575_v61  ;;  %v1779_v15 = vand.u32 8388607, %v1772_v17  ;;  %v5306_v11 = vshrl.u32 %v1784_v41, 5  ;;  %v1796_v4 = vshrl.u32 %v4014_v55, %v1787_v20 }
 0x21c   :  { %v5298_v7 = vsub.s32 %v1008_v22, %v1011_v58  ;;  %v1789_v30 = vshll.u32 %v4011_v47, %v1786_v6  ;;  %v1792_v9 = vshll.u32 %v4012_v51, %v1786_v6  ;;  %v1795_v31 = vshll.u32 %v4013_v53, %v1786_v6 }
 0x21d   :  { %v1548_v16 = vsel %vm1465_vm3, %v1547_v54, %v1546_v23  ;;  %v1798_v34 = vshll.u32 %v4014_v55, %v1786_v6  ;;  %v1799_v44 = vshrl.u32 %v4015_v57, %v1787_v20  ;;  %v1801_v19 = vshll.u32 %v4015_v57, %v1786_v6 }
 0x21e   :  { %v1551_v48 = vsel %vm5252_vm6, %v5015_v21, %v1548_v16  ;;  %v1014_v13 = vsub.s32 0, %v5298_v7  ;;  %v1791_v27 = vor.u32 %v1790_v45, %v1789_v30  ;;  %v1794_v52 = vor.u32 %v1793_v59, %v1792_v9 }
 0x21f   :  { %3947 = vcosq.f32 %v1551_v48  ;;  %v1797_v2 = vor.u32 %v1796_v4, %v1795_v31  ;;  %v1800_v50 = vor.u32 %v1799_v44, %v1798_v34  ;;  %v1802_v42 = vshrl.u32 %v4016_v0, %v1787_v20 }
 0x220   :  { %3949 = vsinq.f32 %v1551_v48  ;;  %v3680_v32 = vmin.u32 %v1014_v13, %v5298_v7  ;;  %v5323_v43 = vand.u32 3, %v3248_v29  ;;  %v1780_v33 = vor.u32 8388608, %v1779_v15 }
 0x221   :  { %v848_v8 = vand.u32 2139095040, %v5318_v39  ;;  %v1004_v22 = vadd.s32 %v5257_v62, %v5262_v49  ;;  %v1788_v28 = vshrl.u32 %v4011_v47, %v1787_v20  ;;  %v1803_v38 = vor.u32 %v1802_v42, %v1801_v19 }
 0x222   :  { %v1016_v41 = vclz %v3680_v32  ;;  %vm1804_vm1 = vcmp.lt.s32.totalorder %v5306_v11, 1  ;;  %vm1806_vm2 = vcmp.lt.s32.totalorder %v5306_v11, 3  ;;  %vm1807_vm3 = vcmp.lt.s32.totalorder %v5306_v11, 4 }
 0x223   :  { %v1812_v6 = vsel %vm1804_vm1, %v1791_v27, %v1794_v52  ;;  %v1809_v35 = vsel %vm1807_vm3, %v1797_v2, 2102212464  ;;  %v1813_v56 = vsel %vm1807_vm3, %v1800_v50, 920167782  ;;  %v1816_v26 = vsel %vm1804_vm1, %v1794_v52, %v1797_v2 }
 0x224   :  { %v3681_v18 = vadd.s32 4294967294, %v1016_v41  ;;  %v1817_v14 = vsel %vm1807_vm3, %v1803_v38, 1326507024  ;;  %vm1561_vm4 = vcmp.eq.s32.totalorder %v5296_v25, 2  ;;  %vm1805_vm6 = vcmp.lt.s32.totalorder %v5306_v11, 2 }
 0x225   :  { %v1814_v62 = vsel %vm1806_vm2, %v1797_v2, %v1813_v56  ;;  %v1818_v49 = vsel %vm1806_vm2, %v1800_v50, %v1817_v14  ;;  %vm1558_vm7 = vcmp.eq.s32.totalorder %v5296_v25, 0  ;;  %v1820_v37 = vshll.u32 %v1780_v33, 8 }
 0x226   :  { %vm3682_vm5 = vcmp.lt.s32.totalorder %v3681_v18, 0  ;;  %v1815_v3 = vsel %vm1805_vm6, %v1812_v6, %v1814_v62  ;;  %v1819_v63 = vsel %vm1805_vm6, %v1816_v26, %v1818_v49  ;;  %vm1557_vm8 = vcmp.lt.s32.totalorder %v5296_v25, 2 }
 0x227   :  { %v1019_v24 = vsel %vm3682_vm5, 0, %v3681_v18  ;;  %vm950_vm9 = vcmp.lt.s32.totalorder %v5132_v40, 0  ;;  %v1808_v46 = vsel %vm1804_vm1, %v1788_v28, %v1791_v27  ;;  %v1810_v10 = vsel %vm1806_vm2, %v1794_v52, %v1809_v35 }
 0x228   :  { %v1020_v36 = vsub.s32 32, %v1019_v24  ;;  %v1024_v20 = vsub.s32 4294967266, %v1019_v24  ;;  %vm1555_vm10 = vweird.f32 %v5015_v21  ;;  %v1021_v54 = vshll.u32 %v5298_v7, %v1019_v24 }
 0x229   :  { %v5354_v23 = vmul.u32.u64.low %v1820_v37, %v1819_v63  ;;  %v5355_v1 = vmul.u32.u64.high %v1820_v37, %v1819_v63, %v5354_v23  ;;  %v5357_v61 = vmul.u32.u64.low %v1820_v37, %v1815_v3  ;;  %v5358_v58 = vmul.u32.u64.high %v1820_v37, %v1815_v3, %v5357_v61  ;;  %v5404_v3 = vpop.f32.mrf.mxu1 }
 0x22a   :  { %v1022_v29 = vshrl.u32 %v1004_v22, %v1020_v36  ;;  %v1025_v45 = vadd.s32 127, %v1024_v20  ;;  %v849_v59 = vshrl.u32 %v848_v8, 23  ;;  %vm3250_vm11 = vcmp.lt.s32.totalorder %v5323_v43, 2 }
 0x22b   :  { %vm3251_vm12 = vcmp.eq.s32.totalorder %v5323_v43, 0  ;;  %vm3254_vm13 = vcmp.eq.s32.totalorder %v5323_v43, 2  ;;  %vm5367_vm14 = vcmp.le.f32.partialorder %v948_v12, 0.7853982  ;;  %v1811_v15 = vsel %vm1805_vm6, %v1808_v46, %v1810_v10 }
 0x22c   :  { %v3948_v4 = vpop.eup %3947  ;;  %v1023_v7 = vor.u32 %v1022_v29, %v1021_v54  ;;  %v1026_v48 = vshll.u32 %v1025_v45, 23  ;;  %v845_v13 = vand.u32 2147483647, %v5318_v39  ;;  %v3675_v30 = vadd.s32 4294967169, %v849_v59 }
 0x22d   :  { %v3950_v9 = vpop.eup %3949  ;;  %v1562_v31 = vxor.u32 2147483648, %v3948_v4  ;;  %v1034_v34 = vsub.s32 4, %v5288_v5  ;;  %vm1829_vm15 = vc.u32 %v5355_v1, %v5357_v61  ;;  %v1830_v12 = vadd.s32 1, %v5358_v58 }
 0x22e   :  { %v1559_v44 = vxor.u32 2147483648, %v3950_v9  ;;  %v1027_v32 = vor.u32 4788187, %v1026_v48  ;;  %v1827_v27 = vmul.u32 %v1820_v37, %v1811_v15  ;;  %v855_v11 = vadd.s32 1, %v3675_v30 }
 0x22f   :  { %v1563_v52 = vsel %vm1561_vm4, %v1562_v31, %v3950_v9  ;;  %v3256_v2 = vsel %vm3254_vm13, %v1562_v31, %v3950_v9  ;;  %v1030_v50 = vcvt.s32.f32 %v1023_v7  ;;  %v1831_v19 = vsel %vm1829_vm15, %v1830_v12, %v5358_v58 }
 0x230   :  { %v1560_v42 = vsel %vm1558_vm7, %v3948_v4, %v1559_v44  ;;  %v3253_v41 = vsel %vm3251_vm12, %v3948_v4, %v1559_v44  ;;  %v1028_v33 = vand.u32 2147483647, %v1027_v32  ;;  %v1832_v8 = vadd.s32 %v1831_v19, %v1827_v27 }
 0x231   :  { %v1564_v22 = vsel %vm1557_vm8, %v1560_v42, %v1563_v52  ;;  %v3257_v28 = vsel %vm3250_vm11, %v3253_v41, %v3256_v2  ;;  %v1035_v38 = vsel %vm950_vm9, %v1034_v34, %v5288_v5  ;;  %vm856_vm0 = vcmp.gt.s32.totalorder %v855_v11, 0 }
 0x232   :  { %v1565_v18 = vsel %vm1555_vm10, nan, %v1564_v22  ;;  %v3258_v6 = vsel %vm1555_vm10, nan, %v3257_v28  ;;  %v1031_v35 = vmul.f32 %v1030_v50, %v1028_v33  ;;  %v1833_v56 = vadd.s32 536870912, %v1832_v8 }
 0x233   :  { %v1887_v26 = vmul.f32 0.088388346, %v1565_v18  ;;  %v3583_v14 = vmul.f32 0.088388346, %v3258_v6  ;;  %v857_v25 = vsel %vm856_vm0, %v855_v11, 0  ;;  %v1037_v43 = vsel %vm5367_vm14, 0, %v1035_v38 }
 0x234   :  { %v1032_v62 = vxor.u32 2147483648, %v1031_v35  ;;  %v5400_v49 = vshrl.u32 %v1833_v56, 30  ;;  %v859_v24 = vand.u32 31, %v857_v25  ;;  %v852_v5 = vand.u32 8388607, %v845_v13 }
 0x235   :  { %1903 = vst [vmem:[#allocation2 + $0x60] sm:$0xff] %v1887_v26  ;;  %3599 = vst [vmem:[#allocation4 + $0x60] sm:$0xff] %v3583_v14  ;;  %v5412_v20 = vand.u32 3, %v1037_v43  ;;  %v2728_v46 = vadd.s32 3, %v1037_v43  ;;  %v1672_v23 = vand.u32 2139095040, %v5404_v3  ;;  %v858_v59 = vshrl.u32 %v857_v25, 5 }
 0x236   :  { %v1033_v21 = vsel %vm950_vm9, %v1032_v62, %v1031_v35  ;;  %v1835_v63 = vshll.u32 %v5400_v49, 30  ;;  %v860_v37 = vsub.s32 32, %v859_v24  ;;  %v853_v58 = vor.u32 8388608, %v852_v5 }
 0x237   :  { %v1036_v36 = vsel %vm5367_vm14, %v5132_v40, %v1033_v21  ;;  %v862_v16 = vshll.u32 %v4011_v47, %v859_v24  ;;  %v865_v4 = vshll.u32 %v4012_v51, %v859_v24  ;;  %v868_v7 = vshll.u32 %v4013_v53, %v859_v24 }
 0x238   :  { %3951 = vcosq.f32 %v1036_v36  ;;  %v5414_v10 = vsub.s32 %v1832_v8, %v1835_v63  ;;  %v863_v54 = vshrl.u32 %v4012_v51, %v860_v37  ;;  %v866_v29 = vshrl.u32 %v4013_v53, %v860_v37 }
 0x239   :  { %3953 = vsinq.f32 %v1036_v36  ;;  %v869_v15 = vshrl.u32 %v4014_v55, %v860_v37  ;;  %v871_v48 = vshll.u32 %v4014_v55, %v859_v24  ;;  %v872_v30 = vshrl.u32 %v4015_v57, %v860_v37 }
 0x23a   :  { %v1838_v45 = vsub.s32 0, %v5414_v10  ;;  %v5426_v9 = vand.u32 3, %v2728_v46  ;;  %v1828_v31 = vadd.s32 %v5357_v61, %v5355_v1  ;;  %v864_v12 = vor.u32 %v863_v54, %v862_v16 }
 0x23b   :  { %v867_v44 = vor.u32 %v866_v29, %v865_v4  ;;  %v870_v32 = vor.u32 %v869_v15, %v868_v7  ;;  %v873_v27 = vor.u32 %v872_v30, %v871_v48  ;;  %v5431_v11 = vshll.u32 %v853_v58, 8 }
 0x23c   :  { %v3712_v34 = vmin.u32 %v1838_v45, %v5414_v10  ;;  %v861_v2 = vshrl.u32 %v4011_v47, %v860_v37  ;;  %v874_v50 = vshll.u32 %v4015_v57, %v859_v24  ;;  %v875_v19 = vshrl.u32 %v4016_v0, %v860_v37 }
 0x23d   :  { %vm1046_vm1 = vcmp.eq.s32.totalorder %v5412_v20, 2  ;;  %vm877_vm2 = vcmp.lt.s32.totalorder %v858_v59, 1  ;;  %vm878_vm3 = vcmp.lt.s32.totalorder %v858_v59, 2  ;;  %vm879_vm4 = vcmp.lt.s32.totalorder %v858_v59, 3 }
 0x23e   :  { %v1840_v52 = vclz %v3712_v34  ;;  %v1673_v1 = vshrl.u32 %v1672_v23, 23  ;;  %vm1043_vm5 = vcmp.eq.s32.totalorder %v5412_v20, 0  ;;  %v876_v42 = vor.u32 %v875_v19, %v874_v50 }
 0x23f   :  { %vm880_vm6 = vcmp.lt.s32.totalorder %v858_v59, 4  ;;  %v881_v41 = vsel %vm877_vm2, %v861_v2, %v864_v12  ;;  %vm1042_vm7 = vcmp.lt.s32.totalorder %v5412_v20, 2  ;;  %vm2730_vm8 = vcmp.lt.s32.totalorder %v5426_v9, 2 }
 0x240   :  { %v3713_v61 = vadd.s32 4294967294, %v1840_v52  ;;  %v882_v33 = vsel %vm880_vm6, %v870_v32, 2102212464  ;;  %v885_v8 = vsel %vm877_vm2, %v864_v12, %v867_v44  ;;  %v886_v22 = vsel %vm880_vm6, %v873_v27, 920167782 }
 0x241   :  { %v889_v28 = vsel %vm877_vm2, %v867_v44, %v870_v32  ;;  %vm1040_vm9 = vweird.f32 %v5132_v40  ;;  %v883_v38 = vsel %vm879_vm4, %v867_v44, %v882_v33  ;;  %v887_v18 = vsel %vm879_vm4, %v870_v32, %v886_v22 }
 0x242   :  { %vm3714_vm10 = vcmp.lt.s32.totalorder %v3713_v61, 0  ;;  %v890_v6 = vsel %vm880_vm6, %v876_v42, 1326507024  ;;  %v888_v56 = vsel %vm878_vm3, %v885_v8, %v887_v18  ;;  %v3707_v14 = vadd.s32 4294967169, %v1673_v1 }
 0x243   :  { %v1843_v35 = vsel %vm3714_vm10, 0, %v3713_v61  ;;  %v891_v26 = vsel %vm879_vm4, %v873_v27, %v890_v6  ;;  %v884_v43 = vsel %vm878_vm3, %v881_v41, %v883_v38  ;;  %vm2731_vm11 = vcmp.eq.s32.totalorder %v5426_v9, 0 }
 0x244   :  { %v1844_v25 = vsub.s32 32, %v1843_v35  ;;  %v1848_v62 = vsub.s32 4294967266, %v1843_v35  ;;  %v892_v24 = vsel %vm878_vm3, %v889_v28, %v891_v26  ;;  %v1845_v58 = vshll.u32 %v5414_v10, %v1843_v35 }
 0x245   :  { %v3952_v5 = vpop.eup %3951  ;;  %v5448_v21 = vmul.u32.u64.low %v5431_v11, %v892_v24  ;;  %v5449_v63 = vmul.u32.u64.high %v5431_v11, %v892_v24, %v5448_v21  ;;  %v5452_v37 = vmul.u32.u64.low %v5431_v11, %v888_v56  ;;  %v5453_v36 = vmul.u32.u64.high %v5431_v11, %v888_v56, %v5452_v37 }
 0x246   :  { %v3954_v46 = vpop.eup %3953  ;;  %v1047_v23 = vxor.u32 2147483648, %v3952_v5  ;;  %v1846_v54 = vshrl.u32 %v1828_v31, %v1844_v25  ;;  %v1849_v29 = vadd.s32 127, %v1848_v62  ;;  %vm2734_vm12 = vcmp.eq.s32.totalorder %v5426_v9, 2 }
 0x247   :  { %v1044_v45 = vxor.u32 2147483648, %v3954_v46  ;;  %v1679_v59 = vadd.s32 1, %v3707_v14  ;;  %v1858_v10 = vsub.s32 4, %v5400_v49  ;;  %v900_v31 = vmul.u32 %v5431_v11, %v884_v43 }
 0x248   :  { %v1048_v16 = vsel %vm1046_vm1, %v1047_v23, %v3954_v46  ;;  %v2736_v15 = vsel %vm2734_vm12, %v1047_v23, %v3954_v46  ;;  %v1847_v4 = vor.u32 %v1846_v54, %v1845_v58  ;;  %v1850_v7 = vshll.u32 %v1849_v29, 23 }
 0x249   :  { %v1045_v48 = vsel %vm1043_vm5, %v3952_v5, %v1044_v45  ;;  %v2733_v30 = vsel %vm2731_vm11, %v3952_v5, %v1044_v45  ;;  %vm902_vm13 = vc.u32 %v5449_v63, %v5452_v37  ;;  %v903_v52 = vadd.s32 1, %v5453_v36 }
 0x24a   :  { %v1049_v34 = vsel %vm1042_vm7, %v1045_v48, %v1048_v16  ;;  %v2737_v12 = vsel %vm2730_vm8, %v2733_v30, %v2736_v15  ;;  %v1851_v44 = vor.u32 4788187, %v1850_v7  ;;  %vm1680_vm14 = vcmp.gt.s32.totalorder %v1679_v59, 0 }
 0x24b   :  { %v1050_v32 = vsel %vm1040_vm9, nan, %v1049_v34  ;;  %v2738_v27 = vsel %vm1040_vm9, nan, %v2737_v12  ;;  %v1854_v50 = vcvt.s32.f32 %v1847_v4  ;;  %vm1774_vm15 = vcmp.lt.s32.totalorder %v5240_v60, 0 }
 0x24c   :  { %v1882_v11 = vmul.f32 0.088388346, %v1050_v32  ;;  %v3578_v2 = vmul.f32 0.088388346, %v2738_v27  ;;  %v1852_v20 = vand.u32 2147483647, %v1851_v44  ;;  %v904_v9 = vsel %vm902_vm13, %v903_v52, %v5453_v36 }
 0x24d   :  { %v1669_v19 = vand.u32 2147483647, %v5404_v3  ;;  %v1681_v1 = vsel %vm1680_vm14, %v1679_v59, 0  ;;  %v1859_v40 = vsel %vm1774_vm15, %v1858_v10, %v5400_v49  ;;  %v905_v42 = vadd.s32 %v904_v9, %v900_v31 }
 0x24e   :  { %1898 = vst [vmem:[#allocation2 + $0x38] sm:$0xff] %v1882_v11  ;;  %3594 = vst [vmem:[#allocation4 + $0x38] sm:$0xff] %v3578_v2  ;;  %v1855_v61 = vmul.f32 %v1854_v50, %v1852_v20  ;;  %v1683_v41 = vand.u32 31, %v1681_v1  ;;  %vm1773_vm0 = vcmp.le.f32.partialorder %v1772_v17, 0.7853982  ;;  %v1682_v24 = vshrl.u32 %v1681_v1, 5 }
 0x24f   :  { %v906_v8 = vadd.s32 536870912, %v905_v42  ;;  %v1861_v28 = vsel %vm1773_vm0, 0, %v1859_v40  ;;  %v1676_v38 = vand.u32 8388607, %v1669_v19  ;;  %vm1864_vm6 = vweird.f32 %v5240_v60 }
 0x250   :  { %v1856_v33 = vxor.u32 2147483648, %v1855_v61  ;;  %v1684_v22 = vsub.s32 32, %v1683_v41  ;;  %v1686_v18 = vshll.u32 %v4011_v47, %v1683_v41  ;;  %v1689_v6 = vshll.u32 %v4012_v51, %v1683_v41 }
 0x251   :  { %v5490_v49 = vshrl.u32 %v906_v8, 30  ;;  %v1695_v17 = vshll.u32 %v4014_v55, %v1683_v41  ;;  %v1692_v5 = vshll.u32 %v4013_v53, %v1683_v41  ;;  %v3560_v46 = vadd.s32 3, %v1861_v28 }
 0x252   :  { %v1857_v35 = vsel %vm1774_vm15, %v1856_v33, %v1855_v61  ;;  %v1687_v56 = vshrl.u32 %v4012_v51, %v1684_v22  ;;  %v1690_v14 = vshrl.u32 %v4013_v53, %v1684_v22  ;;  %v1693_v25 = vshrl.u32 %v4014_v55, %v1684_v22 }
 0x253   :  { %v1860_v26 = vsel %vm1773_vm0, %v5240_v60, %v1857_v35  ;;  %v1696_v62 = vshrl.u32 %v4015_v57, %v1684_v22  ;;  %v908_v43 = vshll.u32 %v5490_v49, 30  ;;  %v1698_v58 = vshll.u32 %v4015_v57, %v1683_v41 }
 0x254   :  { %3955 = vcosq.f32 %v1860_v26  ;;  %v1688_v21 = vor.u32 %v1687_v56, %v1686_v18  ;;  %v1691_v36 = vor.u32 %v1690_v14, %v1689_v6  ;;  %v1699_v54 = vshrl.u32 %v4016_v0, %v1684_v22 }
 0x255   :  { %3957 = vsinq.f32 %v1860_v26  ;;  %v1697_v51 = vor.u32 %v1696_v62, %v1695_v17  ;;  %v5500_v23 = vsub.s32 %v905_v42, %v908_v43  ;;  %v1677_v55 = vor.u32 8388608, %v1676_v38 }
 0x256   :  { %v1694_v29 = vor.u32 %v1693_v25, %v1692_v5  ;;  %v1700_v59 = vor.u32 %v1699_v54, %v1698_v58  ;;  %vm1701_vm1 = vcmp.lt.s32.totalorder %v1682_v24, 1  ;;  %vm1704_vm2 = vcmp.lt.s32.totalorder %v1682_v24, 4 }
 0x257   :  { %v911_v45 = vsub.s32 0, %v5500_v23  ;;  %v1865_v16 = vand.u32 3, %v1861_v28  ;;  %v1709_v53 = vsel %vm1701_vm1, %v1688_v21, %v1691_v36  ;;  %v1710_v15 = vsel %vm1704_vm2, %v1697_v51, 920167782 }
 0x258   :  { %v3561_v4 = vand.u32 3, %v3560_v46  ;;  %vm1703_vm3 = vcmp.lt.s32.totalorder %v1682_v24, 3  ;;  %vm1702_vm4 = vcmp.lt.s32.totalorder %v1682_v24, 2  ;;  %v1713_v0 = vsel %vm1701_vm1, %v1691_v36, %v1694_v29 }
 0x259   :  { %v3676_v7 = vmin.u32 %v911_v45, %v5500_v23  ;;  %v1711_v57 = vsel %vm1703_vm3, %v1694_v29, %v1710_v15  ;;  %v1717_v48 = vshll.u32 %v1677_v55, 8  ;;  %v1706_v10 = vsel %vm1704_vm2, %v1694_v29, 2102212464 }
 0x25a   :  { %v1712_v31 = vsel %vm1702_vm4, %v1709_v53, %v1711_v57  ;;  %v1714_v34 = vsel %vm1704_vm2, %v1700_v59, 1326507024  ;;  %vm1866_vm5 = vcmp.lt.s32.totalorder %v1865_v16, 2  ;;  %v1685_v12 = vshrl.u32 %v4011_v47, %v1684_v22 }
 0x25b   :  { %v913_v30 = vclz %v3676_v7  ;;  %v1715_v44 = vsel %vm1703_vm3, %v1697_v51, %v1714_v34  ;;  %v5514_v52 = vmul.u32.u64.low %v1717_v48, %v1712_v31  ;;  %v5515_v11 = vmul.u32.u64.high %v1717_v48, %v1712_v31, %v5514_v52 }
 0x25c   :  { %v1716_v27 = vsel %vm1702_vm4, %v1713_v0, %v1715_v44  ;;  %v1705_v2 = vsel %vm1701_vm1, %v1685_v12, %v1688_v21  ;;  %v1707_v20 = vsel %vm1703_vm3, %v1691_v36, %v1706_v10  ;;  %vm1867_vm7 = vcmp.eq.s32.totalorder %v1865_v16, 0 }
 0x25d   :  { %v3677_v32 = vadd.s32 4294967294, %v913_v30  ;;  %v5520_v50 = vmul.u32.u64.low %v1717_v48, %v1716_v27  ;;  %v5521_v9 = vmul.u32.u64.high %v1717_v48, %v1716_v27, %v5520_v50  ;;  %vm1870_vm8 = vcmp.eq.s32.totalorder %v1865_v16, 2 }
 0x25e   :  { %vm3562_vm9 = vcmp.lt.s32.totalorder %v3561_v4, 2  ;;  %vm3563_vm11 = vcmp.eq.s32.totalorder %v3561_v4, 0  ;;  %vm3566_vm12 = vcmp.eq.s32.totalorder %v3561_v4, 2  ;;  %v901_v1 = vadd.s32 %v5452_v37, %v5449_v63 }
 0x25f   :  { %vm3678_vm10 = vcmp.lt.s32.totalorder %v3677_v32, 0  ;;  %v1708_v8 = vsel %vm1702_vm4, %v1705_v2, %v1707_v20  ;;  %vm1726_vm13 = vc.u32 %v5521_v9, %v5514_v52  ;;  %v1727_v38 = vadd.s32 1, %v5515_v11 }
 0x260   :  { %v916_v61 = vsel %vm3678_vm10, 0, %v3677_v32  ;;  %v1724_v17 = vmul.u32 %v1717_v48, %v1708_v8  ;;  %vm847_vm14 = vcmp.lt.s32.totalorder %v5318_v39, 0  ;;  %v931_v60 = vsub.s32 4, %v5490_v49 }
 0x261   :  { %v3956_v47 = vpop.eup %3955  ;;  %v917_v41 = vsub.s32 32, %v916_v61  ;;  %v921_v33 = vsub.s32 4294967266, %v916_v61  ;;  %v918_v28 = vshll.u32 %v5500_v23, %v916_v61  ;;  %v1728_v26 = vsel %vm1726_vm13, %v1727_v38, %v5515_v11 }
 0x262   :  { %v3958_v40 = vpop.eup %3957  ;;  %v1871_v42 = vxor.u32 2147483648, %v3956_v47  ;;  %v1729_v21 = vadd.s32 %v1728_v26, %v1724_v17  ;;  %vm846_vm15 = vcmp.le.f32.partialorder %v845_v13, 0.7853982  ;;  %v932_v7 = vsel %vm847_vm14, %v931_v60, %v5490_v49 }
 0x263   :  { %v1868_v22 = vxor.u32 2147483648, %v3958_v40  ;;  %v919_v35 = vshrl.u32 %v901_v1, %v917_v41  ;;  %v922_v63 = vadd.s32 127, %v921_v33  ;;  %v934_v48 = vsel %vm846_vm15, 0, %v932_v7 }
 0x264   :  { %v1872_v18 = vsel %vm1870_vm8, %v1871_v42, %v3958_v40  ;;  %v3568_v6 = vsel %vm3566_vm12, %v1871_v42, %v3958_v40  ;;  %v1730_v23 = vadd.s32 536870912, %v1729_v21  ;;  %v2624_v10 = vadd.s32 3, %v934_v48 }
 0x265   :  { %v1869_v37 = vsel %vm1867_vm7, %v3956_v47, %v1868_v22  ;;  %v3565_v56 = vsel %vm3563_vm11, %v3956_v47, %v1868_v22  ;;  %v920_v62 = vor.u32 %v919_v35, %v918_v28  ;;  %v923_v43 = vshll.u32 %v922_v63, 23 }
 0x266   :  { %v1873_v14 = vsel %vm1866_vm5, %v1869_v37, %v1872_v18  ;;  %v3569_v25 = vsel %vm3562_vm9, %v3565_v56, %v3568_v6  ;;  %v5540_v55 = vshrl.u32 %v1730_v23, 30  ;;  %v1725_v34 = vadd.s32 %v5514_v52, %v5521_v9 }
 0x267   :  { %v1874_v24 = vsel %vm1864_vm6, nan, %v1873_v14  ;;  %v3570_v5 = vsel %vm1864_vm6, nan, %v3569_v25  ;;  %v924_v46 = vor.u32 4788187, %v923_v43  ;;  %v927_v54 = vcvt.s32.f32 %v920_v62 }
 0x268   :  { %v1890_v36 = vmul.f32 0.088388346, %v1874_v24  ;;  %v3586_v51 = vmul.f32 0.088388346, %v3570_v5  ;;  %v1732_v45 = vshll.u32 %v5540_v55, 30  ;;  %v938_v44 = vand.u32 3, %v934_v48 }
 0x269   :  { %v925_v58 = vand.u32 2147483647, %v924_v46  ;;  %v2625_v32 = vand.u32 3, %v2624_v10  ;;  %vm937_vm7 = vweird.f32 %v5318_v39  ;;  %vm1671_vm8 = vcmp.lt.s32.totalorder %v5404_v3, 0 }
 0x26a   :  { %1906 = vst [vmem:[#allocation2 + $0x78] sm:$0xff] %v1890_v36  ;;  %3602 = vst [vmem:[#allocation4 + $0x78] sm:$0xff] %v3586_v51  ;;  %v1733_v16 = vsub.s32 %v1729_v21, %v1732_v45  ;;  %vm939_vm1 = vcmp.lt.s32.totalorder %v938_v44, 2  ;;  %vm940_vm2 = vcmp.eq.s32.totalorder %v938_v44, 0  ;;  %vm943_vm3 = vcmp.eq.s32.totalorder %v938_v44, 2 }
 0x26b   :  { %v928_v29 = vmul.f32 %v927_v54, %v925_v58  ;;  %vm2630_vm4 = vcmp.eq.s32.totalorder %v2625_v32, 2  ;;  %vm2626_vm5 = vcmp.lt.s32.totalorder %v2625_v32, 2  ;;  %vm2627_vm6 = vcmp.eq.s32.totalorder %v2625_v32, 0 }
 0x26c   :  { %v1735_v4 = vsub.s32 0, %v1733_v16  ;;  %v1755_v56 = vsub.s32 4, %v5540_v55  ;;  %vm1670_vm9 = vcmp.le.f32.partialorder %v1669_v19, 0.7853982 }
 0x26d   :  { %v929_v59 = vxor.u32 2147483648, %v928_v29 }
 0x26e   :  { %v3708_v57 = vmin.u32 %v1735_v4, %v1733_v16  ;;  %v1756_v26 = vsel %vm1671_vm8, %v1755_v56, %v5540_v55 }
 0x26f   :  { %v930_v53 = vsel %vm847_vm14, %v929_v59, %v928_v29  ;;  %v1758_v14 = vsel %vm1670_vm9, 0, %v1756_v26 }
 0x270   :  { %v933_v15 = vsel %vm846_vm15, %v5318_v39, %v930_v53  ;;  %v1737_v0 = vclz %v3708_v57  ;;  %v3456_v25 = vadd.s32 3, %v1758_v14  ;;  %v1762_v62 = vand.u32 3, %v1758_v14 }
 0x271   :  { %3959 = vcosq.f32 %v933_v15 }
 0x272   :  { %3961 = vsinq.f32 %v933_v15  ;;  %v3709_v30 = vadd.s32 4294967294, %v1737_v0  ;;  %v3457_v43 = vand.u32 3, %v3456_v25  ;;  %vm1767_vm10 = vcmp.eq.s32.totalorder %v1762_v62, 2 }
 0x273   :  { %vm1764_vm12 = vcmp.eq.s32.totalorder %v1762_v62, 0  ;;  %vm1763_vm14 = vcmp.lt.s32.totalorder %v1762_v62, 2 }
 0x274   :  { %vm3710_vm0 = vcmp.lt.s32.totalorder %v3709_v30, 0  ;;  %vm3462_vm11 = vcmp.eq.s32.totalorder %v3457_v43, 2  ;;  %vm3459_vm13 = vcmp.eq.s32.totalorder %v3457_v43, 0  ;;  %vm3458_vm15 = vcmp.lt.s32.totalorder %v3457_v43, 2 }
 0x275   :  { %v1740_v31 = vsel %vm3710_vm0, 0, %v3709_v30  ;;  %vm1761_vm0 = vweird.f32 %v5404_v3 }
 0x276   :  { %v1741_v12 = vsub.s32 32, %v1740_v31  ;;  %v1745_v13 = vsub.s32 4294967266, %v1740_v31  ;;  %v1742_v27 = vshll.u32 %v1733_v16, %v1740_v31 }
 0x278   :  { %v1743_v11 = vshrl.u32 %v1725_v34, %v1741_v12  ;;  %v1746_v2 = vadd.s32 127, %v1745_v13 }
 0x27a   :  { %v1744_v49 = vor.u32 %v1743_v11, %v1742_v27  ;;  %v1747_v50 = vshll.u32 %v1746_v2, 23 }
 0x27c   :  { %v1748_v40 = vor.u32 4788187, %v1747_v50  ;;  %v1751_v8 = vcvt.s32.f32 %v1744_v49 }
 0x27e   :  { %v3960_v20 = vpop.eup %3959  ;;  %v1749_v33 = vand.u32 2147483647, %v1748_v40 }
 0x27f   :  { %v3962_v47 = vpop.eup %3961  ;;  %v944_v1 = vxor.u32 2147483648, %v3960_v20 }
 0x280   :  { %v941_v61 = vxor.u32 2147483648, %v3962_v47  ;;  %v1752_v6 = vmul.f32 %v1751_v8, %v1749_v33 }
 0x281   :  { %v945_v42 = vsel %vm943_vm3, %v944_v1, %v3962_v47  ;;  %v2632_v52 = vsel %vm2630_vm4, %v944_v1, %v3962_v47 }
 0x282   :  { %v942_v9 = vsel %vm940_vm2, %v3960_v20, %v941_v61  ;;  %v2629_v41 = vsel %vm2627_vm6, %v3960_v20, %v941_v61  ;;  %v1753_v37 = vxor.u32 2147483648, %v1752_v6 }
 0x283   :  { %v946_v22 = vsel %vm939_vm1, %v942_v9, %v945_v42  ;;  %v2633_v28 = vsel %vm2626_vm5, %v2629_v41, %v2632_v52 }
 0x284   :  { %v947_v38 = vsel %vm937_vm7, nan, %v946_v22  ;;  %v2634_v18 = vsel %vm937_vm7, nan, %v2633_v28  ;;  %v1754_v17 = vsel %vm1671_vm8, %v1753_v37, %v1752_v6 }
 0x285   :  { %v1881_v35 = vmul.f32 0.088388346, %v947_v38  ;;  %v3577_v63 = vmul.f32 0.088388346, %v2634_v18  ;;  %v1757_v39 = vsel %vm1670_vm9, %v5404_v3, %v1754_v17 }
 0x286   :  { %3963 = vcosq.f32 %v1757_v39 }
 0x287   :  { %1897 = vst [vmem:[#allocation2 + $0x30] sm:$0xff] %v1881_v35  ;;  %3593 = vst [vmem:[#allocation4 + $0x30] sm:$0xff] %v3577_v63  ;;  %3965 = vsinq.f32 %v1757_v39 }
 0x293   :  { %v3964_v24 = vpop.eup %3963 }
 0x294   :  { %v3966_v5 = vpop.eup %3965  ;;  %v1768_v21 = vxor.u32 2147483648, %v3964_v24 }
 0x295   :  { %v1765_v36 = vxor.u32 2147483648, %v3966_v5 }
 0x296   :  { %v1769_v51 = vsel %vm1767_vm10, %v1768_v21, %v3966_v5  ;;  %v3464_v19 = vsel %vm3462_vm11, %v1768_v21, %v3966_v5 }
 0x297   :  { %v1766_v46 = vsel %vm1764_vm12, %v3964_v24, %v1765_v36  ;;  %v3461_v23 = vsel %vm3459_vm13, %v3964_v24, %v1765_v36 }
 0x298   :  { %v1770_v58 = vsel %vm1763_vm14, %v1766_v46, %v1769_v51  ;;  %v3465_v54 = vsel %vm3458_vm15, %v3461_v23, %v3464_v19 }
 0x299   :  { %v1771_v55 = vsel %vm1761_vm0, nan, %v1770_v58  ;;  %v3466_v29 = vsel %vm1761_vm0, nan, %v3465_v54 }
 0x29a   :  { %v1889_v45 = vmul.f32 0.088388346, %v1771_v55  ;;  %v3585_v59 = vmul.f32 0.088388346, %v3466_v29 }
 0x29c   :  { %1905 = vst [vmem:[#allocation2 + $0x70] sm:$0xff] %v1889_v45  ;;  %3601 = vst [vmem:[#allocation4 + $0x70] sm:$0xff] %v3585_v59 }
 0x29d   :  { %3978 = shalt.err (!%p3975_p4)
}
 0x29e   :  { %s4019_s23 = smov 128   ;;  %s4020_s24 = smov 8  }
 0x29f   :  { %3614 = dma.vmem_to_hbm [thread:$0]  %s3609_s20, 2048, %s5568_s2, [#allocation3], %s4019_s23, %s4019_s23, %s4020_s24  }
 0x2a0   :  { %s3987_s27 = scalar_lea.vmem %s3621_s1, 2048  ;;  %p3992_p6 = scmp.lt.s32.totalorder %s3621_s1, %s3621_s1 }
 0x2a1   :  { %p3988_p5 = scmp.ne.s32.totalorder %s3621_s1, %s3987_s27  ;;  %p3993_p7 = scmp.lt.s32.totalorder %s3987_s27, %s3987_s27 }
 0x2a3   :  { %p3994_p8 = por %p3993_p7, %p3992_p6 }
 0x2a5   :  { %p3995_p9 = pnand %p3994_p8, %p3988_p5 }
 0x2a7   :  { %3998 = shalt.err (!%p3995_p9)
}
 0x2a8   :  { %3626 = dma.vmem_to_hbm [thread:$0]  %s3621_s1, 2048, %s5569_s3, [#allocation5], %s4019_s23, %s4019_s23, %s4020_s24  }
 0x2a9   :  { %4007 = dma.done.wait [#allocation3], 2048  }
 0x2aa   :  { %4008 = vsyncadd [#allocation3], 4294965248 }
 0x2ab   :  { %4009 = dma.done.wait [#allocation5], 2048  }
 0x2ac   :  { %4010 = vsyncadd [#allocation5], 4294965248 }
 0x2ad   :  { %3633 = vsyncpa [#allocation3], 1 }
 0x2ae   :  { %3634 = vsyncpa [#allocation5], 1 }

</bundles_post_ra>
